<compile_context>
chip_gen: v6e
topology: v6e:2x2x1
jax: 0.10.0
libtpu: 0.0.40
codegen_flags: <defaults>
</compile_context>

<pallas_src>
import functools

import numpy as np
import jax
import jax.numpy as jnp
from jax import lax
from jax.experimental import pallas as pl
from jax.experimental.pallas import tpu as pltpu

LRELU_SLOPE = 0.1
IN_EPS = 1e-5

# Tap order matches the (kh, kw) row-major weight flattening in pack_params.
_TAPS = [(-1, -1), (-1, 0), (-1, 1),
         (0, -1), (0, 0), (0, 1),
         (1, -1), (1, 0), (1, 1)]

_PARAM_KEYS = ("enc_w", "enc_b", "w1", "b1", "gamma", "beta",
               "w2", "b2", "wid", "bid", "hin")


def _leaky(x):
    return jnp.maximum(x, LRELU_SLOPE * x)


def _sigmoid(z):
    # sigmoid(z) == 0.5 * tanh(z/2) + 0.5 : one EUP op, no divide / selects.
    return 0.5 * jnp.tanh(0.5 * z) + 0.5


# ----------------------------------------------------------------------------
# Fused kernel: full InvSplit forward for one batch-packed group.
# ----------------------------------------------------------------------------
def _inv_split_kernel(x_ref, tapm_ref, ew_ref, eb_ref,
                      w1_ref, b1_ref, g_ref, bt_ref,
                      w2_ref, b2_ref, wid_ref, bid_ref, hin_ref,
                      low_ref, high_ref, patch_ref, *, H, W, C2):
    N = H * W
    f32 = jnp.float32

    x = x_ref[0]                                   # (C2, N), batch-packed rows

    # Hoisted once, reused by all four convs / both UNet blocks.
    hin = hin_ref[...] > 0.5                       # (C2, 1) HIN row selector
    tap_masks = [None if (dy == 0 and dx == 0)
                 else tapm_ref[pl.ds(t, 1), :]     # (1, N) edge-validity mask
                 for t, (dy, dx) in enumerate(_TAPS)]

    # Encoder 1x1 conv as a single dot; rows were pre-permuted in pack_params
    # so the x1/x2 split below is an aligned sublane slice.
    xe = jnp.dot(ew_ref[...], x, preferred_element_type=f32) + eb_ref[...]
    xe1 = xe[:C2]
    xe2 = xe[C2:]

    def conv3x3(xin, w_flat, b):
        # xin: (C2, N).  Build the (9*C2, N) im2col patch with XLU rolls plus
        # precomputed edge masks; every patch_ref store is an aligned full
        # (C2, N) slab (C2 == 8 when two batch elements are packed).
        for t, (dy, dx) in enumerate(_TAPS):
            s = dy * W + dx
            if s == 0:
                slab = xin
            else:
                slab = pltpu.roll(xin, (-s) % N, 1) * tap_masks[t]
            patch_ref[t * C2:(t + 1) * C2, :] = slab
        return jnp.dot(w_flat, patch_ref[...],
                       preferred_element_type=f32) + b

    def unet_block(k, xin):
        # conv_1 + Half-Instance-Norm (per-row mean/var folded into a single
        # scale/shift) + LeakyReLU
        a = conv3x3(xin, w1_ref[k], b1_ref[k])
        mean = jnp.mean(a, axis=1, keepdims=True)
        var = jnp.mean(a * a, axis=1, keepdims=True) - mean * mean
        scale = g_ref[k] * lax.rsqrt(var + IN_EPS)
        shift = bt_ref[k] - mean * scale
        h = _leaky(jnp.where(hin, a * scale + shift, a))
        # conv_2 + LeakyReLU, identity 1x1
        a2 = _leaky(conv3x3(h, w2_ref[k], b2_ref[k]))
        ident = jnp.dot(wid_ref[k], xin,
                        preferred_element_type=f32) + bid_ref[k]
        return a2 + ident

    x2n = xe2 - unet_block(0, xe1)    # x2 = x2 - predict(x1)
    x1n = xe1 + unet_block(1, x2n)    # x1 = x1 + update(x2)

    low_ref[0] = _sigmoid(x1n)
    high_ref[0] = _sigmoid(x2n)


# ----------------------------------------------------------------------------
# Wrapper: one pallas_call over the packed batch.
# ----------------------------------------------------------------------------
def inv_split_forward(x, packed):
    """x: (B, channel_split_num, H, W) in NCHW (PyTorch layout)."""
    B, s1, H, W = x.shape
    N = H * W
    P = packed["enc_w"].shape[1] // s1            # batch elements per step
    s2 = packed["enc_w"].shape[0] // P - s1
    if s1 != s2:
        raise ValueError("InvSplit forward requires split_len1 == split_len2")
    if B % P != 0:
        raise ValueError(f"batch {B} not divisible by pack factor {P}")
    G = B // P
    C2 = P * s1

    x_packed = x.reshape(G, C2, N)

    # Static (H, W)-dependent 3x3 edge-validity masks, one row per tap.
    ys, xs = np.meshgrid(np.arange(H), np.arange(W), indexing="ij")
    tap_mask = jnp.asarray(np.stack(
        [((ys + dy >= 0) & (ys + dy < H) & (xs + dx >= 0) & (xs + dx < W))
         .reshape(-1) for dy, dx in _TAPS]).astype(np.float32))   # (9, N)

    weights = [packed[k] for k in _PARAM_KEYS]

    def _full_spec(a):
        return pl.BlockSpec(a.shape, lambda i: (0,) * a.ndim)

    in_specs = ([pl.BlockSpec((1, C2, N), lambda i: (i, 0, 0)),
                 _full_spec(tap_mask)]
                + [_full_spec(a) for a in weights])

    flops = G * N * C2 * C2 * (4 + 4 * 2 * 9 + 2 * 2)
    transcendentals = G * (2 * C2 * N + 4 * C2)
    bytes_accessed = 4 * (3 * G * C2 * N + int(tap_mask.size)
                          + sum(int(a.size) for a in weights))

    kern = functools.partial(_inv_split_kernel, H=H, W=W, C2=C2)
    low, high = pl.pallas_call(
        kern,
        out_shape=(jax.ShapeDtypeStruct((G, C2, N), jnp.float32),
                   jax.ShapeDtypeStruct((G, C2, N), jnp.float32)),
        grid=(G,),
        in_specs=in_specs,
        out_specs=(pl.BlockSpec((1, C2, N), lambda i: (i, 0, 0)),
                   pl.BlockSpec((1, C2, N), lambda i: (i, 0, 0))),
        scratch_shapes=[pltpu.VMEM((9 * C2, N), jnp.float32)],
        compiler_params=pltpu.CompilerParams(
            dimension_semantics=("parallel",)),
        cost_estimate=pl.CostEstimate(flops=flops,
                                      transcendentals=transcendentals,
                                      bytes_accessed=bytes_accessed),
    )(x_packed, tap_mask, *weights)

    return low.reshape(B, s1, H, W), high.reshape(B, s2, H, W)


# ----------------------------------------------------------------------------
# Parameter handling: PyTorch-style params -> batch-packed kernel layout.
# ----------------------------------------------------------------------------
def pack_params(tp, channel_split_num, pack=2):
    """Build block-diagonal (batch-packed) weights for `pack` batch elements."""
    s1 = channel_split_num
    enc_w = tp["enc_w"][:, :, 0, 0]               # (channel_num, s1)
    enc_b = tp["enc_b"]
    s2 = enc_w.shape[0] - s1
    if s1 != s2:
        raise ValueError("InvSplit forward requires split_len1 == split_len2")
    P = pack
    eye_p = jnp.eye(P, dtype=jnp.float32)

    def bd(w2d):                                   # (co, ci) -> (P*co, P*ci)
        return jnp.kron(eye_p, w2d)

    def rep(v):                                    # (c,) -> (P*c, 1)
        return jnp.tile(v, (P,)).reshape(P * v.shape[0], 1)

    def flat3x3(w):                                # (co,ci,3,3)->(P*co,9*P*ci)
        return jnp.concatenate(
            [bd(w[:, :, kh, kw]) for kh in range(3) for kw in range(3)],
            axis=1)

    def blk(bp):
        half = s2 // 2
        g = jnp.concatenate([bp["gamma"], jnp.ones((s2 - half,), jnp.float32)])
        bt = jnp.concatenate([bp["beta"], jnp.zeros((s2 - half,), jnp.float32)])
        return dict(
            w1=flat3x3(bp["w1"]), b1=rep(bp["b1"]),
            gamma=rep(g), beta=rep(bt),
            w2=flat3x3(bp["w2"]), b2=rep(bp["b2"]),
            wid=bd(bp["wid"][:, :, 0, 0]), bid=rep(bp["bid"]))

    pr, up = blk(tp["predict"]), blk(tp["update"])
    stk = lambda a, b: jnp.stack([a, b], axis=0)

    hin = rep(jnp.concatenate([jnp.ones((s2 // 2,), jnp.float32),
                               jnp.zeros((s2 - s2 // 2,), jnp.float32)]))

    # Encoder rows ordered [x1 rows (batch-packed), x2 rows (batch-packed)] so
    # the in-kernel split is an aligned sublane slice.
    enc_w_full = jnp.concatenate([bd(enc_w[:s1]), bd(enc_w[s1:])], axis=0)
    enc_b_full = jnp.concatenate([rep(enc_b[:s1]), rep(enc_b[s1:])], axis=0)

    return dict(
        enc_w=enc_w_full, enc_b=enc_b_full,
        w1=stk(pr["w1"], up["w1"]), b1=stk(pr["b1"], up["b1"]),
        gamma=stk(pr["gamma"], up["gamma"]), beta=stk(pr["beta"], up["beta"]),
        w2=stk(pr["w2"], up["w2"]), b2=stk(pr["b2"], up["b2"]),
        wid=stk(pr["wid"], up["wid"]), bid=stk(pr["bid"], up["bid"]),
        hin=hin)


def _init_unet_block(key, cin, cout):
    ks = jax.random.split(key, 6)
    half = cout // 2
    return {
        "w1": jax.random.normal(ks[0], (cout, cin, 3, 3), jnp.float32)
              / (3.0 * cin ** 0.5),
        "b1": jax.random.normal(ks[1], (cout,), jnp.float32) * 0.01,
        "w2": jax.random.normal(ks[2], (cout, cout, 3, 3), jnp.float32)
              / (3.0 * cout ** 0.5),
        "b2": jax.random.normal(ks[3], (cout,), jnp.float32) * 0.01,
        "wid": jax.random.normal(ks[4], (cout, cin, 1, 1), jnp.float32)
               / (cin ** 0.5),
        "bid": jax.random.normal(ks[5], (cout,), jnp.float32) * 0.01,
        # InstanceNorm2d(cout//2, affine=True) default init
        "gamma": jnp.ones((half,), jnp.float32),
        "beta": jnp.zeros((half,), jnp.float32),
    }


def init_inv_split(key, channel_num, channel_split_num):
    s1 = channel_split_num
    k1, k2, k3, k4 = jax.random.split(key, 4)
    return {
        "enc_w": jax.random.normal(k1, (channel_num, s1, 1, 1), jnp.float32)
                 / (s1 ** 0.5),
        "enc_b": jax.random.normal(k2, (channel_num,), jnp.float32) * 0.01,
        "predict": _init_unet_block(k3, s1, channel_num - s1),
        "update": _init_unet_block(k4, s1, channel_num - s1),
    }


# ----------------------------------------------------------------------------
# Pure-JAX reference (mirrors the PyTorch module) for a correctness check.
# ----------------------------------------------------------------------------
def _conv2d_ref(x, w, b, pad):
    out = lax.conv_general_dilated(
        x, w, window_strides=(1, 1), padding=((pad, pad), (pad, pad)),
        dimension_numbers=("NCHW", "OIHW", "NCHW"),
        precision=lax.Precision.HIGHEST)
    return out + b.reshape(1, -1, 1, 1)


def _unet_block_ref(x, bp):
    out = _conv2d_ref(x, bp["w1"], bp["b1"], 1)
    half = out.shape[1] // 2
    o1, o2 = out[:, :half], out[:, half:]
    mean = o1.mean(axis=(2, 3), keepdims=True)
    var = ((o1 - mean) ** 2).mean(axis=(2, 3), keepdims=True)
    o1 = (o1 - mean) / jnp.sqrt(var + IN_EPS)
    o1 = o1 * bp["gamma"].reshape(1, -1, 1, 1) + bp["beta"].reshape(1, -1, 1, 1)
    out = jnp.where(jnp.concatenate([o1, o2], axis=1) > 0,
                    jnp.concatenate([o1, o2], axis=1),
                    LRELU_SLOPE * jnp.concatenate([o1, o2], axis=1))
    out = _conv2d_ref(out, bp["w2"], bp["b2"], 1)
    out = jnp.where(out > 0, out, LRELU_SLOPE * out)
    return out + _conv2d_ref(x, bp["wid"], bp["bid"], 0)


def inv_split_reference(x, tp):
    s1 = x.shape[1]
    xe = _conv2d_ref(x, tp["enc_w"], tp["enc_b"], 0)
    x1, x2 = xe[:, :s1], xe[:, s1:]
    x2 = x2 - _unet_block_ref(x1, tp["predict"])
    x1 = x1 + _unet_block_ref(x2, tp["update"])
    return jax.nn.sigmoid(x1), jax.nn.sigmoid(x2)


if __name__ == "__main__":
    # channel_num=8, channel_split_num=4 (split_len1 == split_len2 == 4, as the
    # PyTorch forward implicitly requires), is_pixel=False.
    B, H, W = 2, 16, 16
    channel_split_num, channel_num = 4, 8

    key = jax.random.PRNGKey(0)
    kx, kp = jax.random.split(key)
    x = jax.random.normal(kx, (B, channel_split_num, H, W), jnp.float32)
    tparams = init_inv_split(kp, channel_num, channel_split_num)
    packed = pack_params(tparams, channel_split_num,
                         pack=2 if B % 2 == 0 else 1)

    fwd = jax.jit(inv_split_forward)
    x_low, x_high = fwd(x, packed)
    jax.block_until_ready((x_low, x_high))

    assert x_low.shape == (B, channel_split_num, H, W)
    assert x_high.shape == (B, channel_num - channel_split_num, H, W)

    # Tolerance accounts for default-precision MXU matmuls in the kernel vs the
    # HIGHEST-precision XLA reference (outputs are post-sigmoid, in (0, 1)).
    ref_low, ref_high = jax.jit(inv_split_reference)(x, tparams)
    np.testing.assert_allclose(np.asarray(x_low), np.asarray(ref_low),
                               rtol=5e-3, atol=5e-3)
    np.testing.assert_allclose(np.asarray(x_high), np.asarray(ref_high),
                               rtol=5e-3, atol=5e-3)
    print("KERNEL_OK")
</pallas_src>

<mosaic_0001>
module attributes {stable_mosaic.version = 11 : i64} {
  func.func @_inv_split_kernel(%arg0: i32, %arg1: memref<1x8x256xf32, #tpu.memory_space<vmem>>, %arg2: memref<9x256xf32, #tpu.memory_space<vmem>>, %arg3: memref<16x8xf32, #tpu.memory_space<vmem>>, %arg4: memref<16x1xf32, #tpu.memory_space<vmem>>, %arg5: memref<2x8x72xf32, #tpu.memory_space<vmem>>, %arg6: memref<2x8x1xf32, #tpu.memory_space<vmem>>, %arg7: memref<2x8x1xf32, #tpu.memory_space<vmem>>, %arg8: memref<2x8x1xf32, #tpu.memory_space<vmem>>, %arg9: memref<2x8x72xf32, #tpu.memory_space<vmem>>, %arg10: memref<2x8x1xf32, #tpu.memory_space<vmem>>, %arg11: memref<2x8x8xf32, #tpu.memory_space<vmem>>, %arg12: memref<2x8x1xf32, #tpu.memory_space<vmem>>, %arg13: memref<8x1xf32, #tpu.memory_space<vmem>>, %arg14: memref<1x8x256xf32, #tpu.memory_space<vmem>>, %arg15: memref<1x8x256xf32, #tpu.memory_space<vmem>>, %arg16: memref<72x256xf32, #tpu.memory_space<vmem>>) attributes {dimension_semantics = [#tpu.dimension_semantics<parallel>], iteration_bounds = array<i64: 1>, scalar_prefetch = 0 : i64, scratch_operands = 1 : i64, tpu.core_type = #tpu.core_type<tc>, window_params = [{transform_indices = @transform_0, window_bounds = array<i64: 1, 8, 256>}, {pipeline_mode = #tpu.pipeline_mode<synchronous>, transform_indices = @transform_1, window_bounds = array<i64: 9, 256>}, {pipeline_mode = #tpu.pipeline_mode<synchronous>, transform_indices = @transform_2, window_bounds = array<i64: 16, 8>}, {pipeline_mode = #tpu.pipeline_mode<synchronous>, transform_indices = @transform_3, window_bounds = array<i64: 16, 1>}, {pipeline_mode = #tpu.pipeline_mode<synchronous>, transform_indices = @transform_4, window_bounds = array<i64: 2, 8, 72>}, {pipeline_mode = #tpu.pipeline_mode<synchronous>, transform_indices = @transform_5, window_bounds = array<i64: 2, 8, 1>}, {pipeline_mode = #tpu.pipeline_mode<synchronous>, transform_indices = @transform_6, window_bounds = array<i64: 2, 8, 1>}, {pipeline_mode = #tpu.pipeline_mode<synchronous>, transform_indices = @transform_7, window_bounds = array<i64: 2, 8, 1>}, {pipeline_mode = #tpu.pipeline_mode<synchronous>, transform_indices = @transform_8, window_bounds = array<i64: 2, 8, 72>}, {pipeline_mode = #tpu.pipeline_mode<synchronous>, transform_indices = @transform_9, window_bounds = array<i64: 2, 8, 1>}, {pipeline_mode = #tpu.pipeline_mode<synchronous>, transform_indices = @transform_10, window_bounds = array<i64: 2, 8, 8>}, {pipeline_mode = #tpu.pipeline_mode<synchronous>, transform_indices = @transform_11, window_bounds = array<i64: 2, 8, 1>}, {pipeline_mode = #tpu.pipeline_mode<synchronous>, transform_indices = @transform_12, window_bounds = array<i64: 8, 1>}, {transform_indices = @transform_13, window_bounds = array<i64: 1, 8, 256>}, {transform_indices = @transform_14, window_bounds = array<i64: 1, 8, 256>}]} {
    %c0 = arith.constant 0 : index
    %c0_0 = arith.constant 0 : index
    %c0_1 = arith.constant 0 : index
    %0 = vector.load %arg1[%c0, %c0_0, %c0_1] : memref<1x8x256xf32, #tpu.memory_space<vmem>>, vector<1x8x256xf32>
    %1 = vector.shape_cast %0 : vector<1x8x256xf32> to vector<8x256xf32>
    %c0_2 = arith.constant 0 : index
    %c0_3 = arith.constant 0 : index
    %2 = vector.load %arg13[%c0_2, %c0_3] : memref<8x1xf32, #tpu.memory_space<vmem>>, vector<8x1xf32>
    %cst = arith.constant 5.000000e-01 : f32
    %3 = vector.broadcast %cst : f32 to vector<8x1xf32>
    %4 = arith.cmpf ogt, %2, %3 : vector<8x1xf32>
    %c0_4 = arith.constant 0 : index
    %c0_5 = arith.constant 0 : index
    %5 = vector.load %arg2[%c0_4, %c0_5] : memref<9x256xf32, #tpu.memory_space<vmem>>, vector<1x256xf32>
    %c1 = arith.constant 1 : index
    %c0_6 = arith.constant 0 : index
    %6 = vector.load %arg2[%c1, %c0_6] : memref<9x256xf32, #tpu.memory_space<vmem>>, vector<1x256xf32>
    %c2 = arith.constant 2 : index
    %c0_7 = arith.constant 0 : index
    %7 = vector.load %arg2[%c2, %c0_7] : memref<9x256xf32, #tpu.memory_space<vmem>>, vector<1x256xf32>
    %c3 = arith.constant 3 : index
    %c0_8 = arith.constant 0 : index
    %8 = vector.load %arg2[%c3, %c0_8] : memref<9x256xf32, #tpu.memory_space<vmem>>, vector<1x256xf32>
    %c5 = arith.constant 5 : index
    %c0_9 = arith.constant 0 : index
    %9 = vector.load %arg2[%c5, %c0_9] : memref<9x256xf32, #tpu.memory_space<vmem>>, vector<1x256xf32>
    %c6 = arith.constant 6 : index
    %c0_10 = arith.constant 0 : index
    %10 = vector.load %arg2[%c6, %c0_10] : memref<9x256xf32, #tpu.memory_space<vmem>>, vector<1x256xf32>
    %c7 = arith.constant 7 : index
    %c0_11 = arith.constant 0 : index
    %11 = vector.load %arg2[%c7, %c0_11] : memref<9x256xf32, #tpu.memory_space<vmem>>, vector<1x256xf32>
    %c8 = arith.constant 8 : index
    %c0_12 = arith.constant 0 : index
    %12 = vector.load %arg2[%c8, %c0_12] : memref<9x256xf32, #tpu.memory_space<vmem>>, vector<1x256xf32>
    %c0_13 = arith.constant 0 : index
    %c0_14 = arith.constant 0 : index
    %13 = vector.load %arg3[%c0_13, %c0_14] : memref<16x8xf32, #tpu.memory_space<vmem>>, vector<16x8xf32>
    %cst_15 = arith.constant dense<0.000000e+00> : vector<16x256xf32>
    %14 = tpu.matmul %13, %1, %cst_15 {dimension_numbers = #tpu.dot_dimension_numbers<[1], [0], [0], [1], [0, 0, 1, 1], [], []>} : vector<16x8xf32>, vector<8x256xf32>, vector<16x256xf32> -> vector<16x256xf32>
    %c0_16 = arith.constant 0 : index
    %c0_17 = arith.constant 0 : index
    %15 = vector.load %arg4[%c0_16, %c0_17] : memref<16x1xf32, #tpu.memory_space<vmem>>, vector<16x1xf32>
    %16 = vector.broadcast %15 : vector<16x1xf32> to vector<16x256xf32>
    %17 = arith.addf %14, %16 : vector<16x256xf32>
    %18 = vector.extract_strided_slice %17 {offsets = [0, 0], sizes = [8, 256], strides = [1, 1]} : vector<16x256xf32> to vector<8x256xf32>
    %19 = vector.extract_strided_slice %17 {offsets = [8, 0], sizes = [8, 256], strides = [1, 1]} : vector<16x256xf32> to vector<8x256xf32>
    %c0_18 = arith.constant 0 : index
    %c0_19 = arith.constant 0 : index
    %c0_20 = arith.constant 0 : index
    %20 = vector.load %arg5[%c0_18, %c0_19, %c0_20] : memref<2x8x72xf32, #tpu.memory_space<vmem>>, vector<1x8x72xf32>
    %21 = vector.shape_cast %20 : vector<1x8x72xf32> to vector<8x72xf32>
    %c0_21 = arith.constant 0 : index
    %c0_22 = arith.constant 0 : index
    %c0_23 = arith.constant 0 : index
    %22 = vector.load %arg6[%c0_21, %c0_22, %c0_23] : memref<2x8x1xf32, #tpu.memory_space<vmem>>, vector<1x8x1xf32>
    %23 = vector.shape_cast %22 : vector<1x8x1xf32> to vector<8x1xf32>
    %c17_i32 = arith.constant 17 : i32
    %24 = tpu.dynamic_rotate %18 by %c17_i32 dim 1 : vector<8x256xf32>, i32 -> vector<8x256xf32>
    %25 = vector.broadcast %5 : vector<1x256xf32> to vector<8x256xf32>
    %26 = arith.mulf %24, %25 : vector<8x256xf32>
    %c0_24 = arith.constant 0 : index
    %c0_25 = arith.constant 0 : index
    %27 = vector.load %arg16[%c0_24, %c0_25] : memref<72x256xf32, #tpu.memory_space<vmem>>, vector<8x256xf32>
    tpu.vector_store %arg16[%c0_24, %c0_25], %26 {strides = array<i32>} : memref<72x256xf32, #tpu.memory_space<vmem>>, vector<8x256xf32>,
    %c16_i32 = arith.constant 16 : i32
    %28 = tpu.dynamic_rotate %18 by %c16_i32 dim 1 : vector<8x256xf32>, i32 -> vector<8x256xf32>
    %29 = vector.broadcast %6 : vector<1x256xf32> to vector<8x256xf32>
    %30 = arith.mulf %28, %29 : vector<8x256xf32>
    %c8_26 = arith.constant 8 : index
    %c0_27 = arith.constant 0 : index
    %31 = vector.load %arg16[%c8_26, %c0_27] : memref<72x256xf32, #tpu.memory_space<vmem>>, vector<8x256xf32>
    tpu.vector_store %arg16[%c8_26, %c0_27], %30 {strides = array<i32>} : memref<72x256xf32, #tpu.memory_space<vmem>>, vector<8x256xf32>,
    %c15_i32 = arith.constant 15 : i32
    %32 = tpu.dynamic_rotate %18 by %c15_i32 dim 1 : vector<8x256xf32>, i32 -> vector<8x256xf32>
    %33 = vector.broadcast %7 : vector<1x256xf32> to vector<8x256xf32>
    %34 = arith.mulf %32, %33 : vector<8x256xf32>
    %c16 = arith.constant 16 : index
    %c0_28 = arith.constant 0 : index
    %35 = vector.load %arg16[%c16, %c0_28] : memref<72x256xf32, #tpu.memory_space<vmem>>, vector<8x256xf32>
    tpu.vector_store %arg16[%c16, %c0_28], %34 {strides = array<i32>} : memref<72x256xf32, #tpu.memory_space<vmem>>, vector<8x256xf32>,
    %c1_i32 = arith.constant 1 : i32
    %36 = tpu.dynamic_rotate %18 by %c1_i32 dim 1 : vector<8x256xf32>, i32 -> vector<8x256xf32>
    %37 = vector.broadcast %8 : vector<1x256xf32> to vector<8x256xf32>
    %38 = arith.mulf %36, %37 : vector<8x256xf32>
    %c24 = arith.constant 24 : index
    %c0_29 = arith.constant 0 : index
    %39 = vector.load %arg16[%c24, %c0_29] : memref<72x256xf32, #tpu.memory_space<vmem>>, vector<8x256xf32>
    tpu.vector_store %arg16[%c24, %c0_29], %38 {strides = array<i32>} : memref<72x256xf32, #tpu.memory_space<vmem>>, vector<8x256xf32>,
    %c32 = arith.constant 32 : index
    %c0_30 = arith.constant 0 : index
    %40 = vector.load %arg16[%c32, %c0_30] : memref<72x256xf32, #tpu.memory_space<vmem>>, vector<8x256xf32>
    tpu.vector_store %arg16[%c32, %c0_30], %18 {strides = array<i32>} : memref<72x256xf32, #tpu.memory_space<vmem>>, vector<8x256xf32>,
    %c255_i32 = arith.constant 255 : i32
    %41 = tpu.dynamic_rotate %18 by %c255_i32 dim 1 : vector<8x256xf32>, i32 -> vector<8x256xf32>
    %42 = vector.broadcast %9 : vector<1x256xf32> to vector<8x256xf32>
    %43 = arith.mulf %41, %42 : vector<8x256xf32>
    %c40 = arith.constant 40 : index
    %c0_31 = arith.constant 0 : index
    %44 = vector.load %arg16[%c40, %c0_31] : memref<72x256xf32, #tpu.memory_space<vmem>>, vector<8x256xf32>
    tpu.vector_store %arg16[%c40, %c0_31], %43 {strides = array<i32>} : memref<72x256xf32, #tpu.memory_space<vmem>>, vector<8x256xf32>,
    %c241_i32 = arith.constant 241 : i32
    %45 = tpu.dynamic_rotate %18 by %c241_i32 dim 1 : vector<8x256xf32>, i32 -> vector<8x256xf32>
    %46 = vector.broadcast %10 : vector<1x256xf32> to vector<8x256xf32>
    %47 = arith.mulf %45, %46 : vector<8x256xf32>
    %c48 = arith.constant 48 : index
    %c0_32 = arith.constant 0 : index
    %48 = vector.load %arg16[%c48, %c0_32] : memref<72x256xf32, #tpu.memory_space<vmem>>, vector<8x256xf32>
    tpu.vector_store %arg16[%c48, %c0_32], %47 {strides = array<i32>} : memref<72x256xf32, #tpu.memory_space<vmem>>, vector<8x256xf32>,
    %c240_i32 = arith.constant 240 : i32
    %49 = tpu.dynamic_rotate %18 by %c240_i32 dim 1 : vector<8x256xf32>, i32 -> vector<8x256xf32>
    %50 = vector.broadcast %11 : vector<1x256xf32> to vector<8x256xf32>
    %51 = arith.mulf %49, %50 : vector<8x256xf32>
    %c56 = arith.constant 56 : index
    %c0_33 = arith.constant 0 : index
    %52 = vector.load %arg16[%c56, %c0_33] : memref<72x256xf32, #tpu.memory_space<vmem>>, vector<8x256xf32>
    tpu.vector_store %arg16[%c56, %c0_33], %51 {strides = array<i32>} : memref<72x256xf32, #tpu.memory_space<vmem>>, vector<8x256xf32>,
    %c239_i32 = arith.constant 239 : i32
    %53 = tpu.dynamic_rotate %18 by %c239_i32 dim 1 : vector<8x256xf32>, i32 -> vector<8x256xf32>
    %54 = vector.broadcast %12 : vector<1x256xf32> to vector<8x256xf32>
    %55 = arith.mulf %53, %54 : vector<8x256xf32>
    %c64 = arith.constant 64 : index
    %c0_34 = arith.constant 0 : index
    %56 = vector.load %arg16[%c64, %c0_34] : memref<72x256xf32, #tpu.memory_space<vmem>>, vector<8x256xf32>
    tpu.vector_store %arg16[%c64, %c0_34], %55 {strides = array<i32>} : memref<72x256xf32, #tpu.memory_space<vmem>>, vector<8x256xf32>,
    %c0_35 = arith.constant 0 : index
    %c0_36 = arith.constant 0 : index
    %57 = vector.load %arg16[%c0_35, %c0_36] : memref<72x256xf32, #tpu.memory_space<vmem>>, vector<72x256xf32>
    %cst_37 = arith.constant dense<0.000000e+00> : vector<8x256xf32>
    %58 = tpu.matmul %21, %57, %cst_37 {dimension_numbers = #tpu.dot_dimension_numbers<[1], [0], [0], [1], [0, 0, 1, 1], [], []>} : vector<8x72xf32>, vector<72x256xf32>, vector<8x256xf32> -> vector<8x256xf32>
    %59 = vector.broadcast %23 : vector<8x1xf32> to vector<8x256xf32>
    %60 = arith.addf %58, %59 : vector<8x256xf32>
    %cst_38 = arith.constant dense<0.000000e+00> : vector<8xf32>
    %61 = vector.multi_reduction <add>, %60, %cst_38 [1] : vector<8x256xf32> to vector<8xf32>
    %62 = vector.shape_cast %61 : vector<8xf32> to vector<8x1xf32>
    %cst_39 = arith.constant 2.560000e+02 : f32
    %63 = vector.broadcast %cst_39 : f32 to vector<8x1xf32>
    %64 = arith.divf %62, %63 : vector<8x1xf32>
    %65 = arith.mulf %60, %60 : vector<8x256xf32>
    %cst_40 = arith.constant dense<0.000000e+00> : vector<8xf32>
    %66 = vector.multi_reduction <add>, %65, %cst_40 [1] : vector<8x256xf32> to vector<8xf32>
    %67 = vector.shape_cast %66 : vector<8xf32> to vector<8x1xf32>
    %cst_41 = arith.constant 2.560000e+02 : f32
    %68 = vector.broadcast %cst_41 : f32 to vector<8x1xf32>
    %69 = arith.divf %67, %68 : vector<8x1xf32>
    %70 = arith.mulf %64, %64 : vector<8x1xf32>
    %71 = arith.subf %69, %70 : vector<8x1xf32>
    %c0_42 = arith.constant 0 : index
    %c0_43 = arith.constant 0 : index
    %c0_44 = arith.constant 0 : index
    %72 = vector.load %arg7[%c0_42, %c0_43, %c0_44] : memref<2x8x1xf32, #tpu.memory_space<vmem>>, vector<1x8x1xf32>
    %73 = vector.shape_cast %72 : vector<1x8x1xf32> to vector<8x1xf32>
    %cst_45 = arith.constant 9.99999974E-6 : f32
    %74 = vector.broadcast %cst_45 : f32 to vector<8x1xf32>
    %75 = arith.addf %71, %74 : vector<8x1xf32>
    %76 = math.rsqrt %75 : vector<8x1xf32>
    %77 = arith.mulf %73, %76 : vector<8x1xf32>
    %c0_46 = arith.constant 0 : index
    %c0_47 = arith.constant 0 : index
    %c0_48 = arith.constant 0 : index
    %78 = vector.load %arg8[%c0_46, %c0_47, %c0_48] : memref<2x8x1xf32, #tpu.memory_space<vmem>>, vector<1x8x1xf32>
    %79 = vector.shape_cast %78 : vector<1x8x1xf32> to vector<8x1xf32>
    %80 = arith.mulf %64, %77 : vector<8x1xf32>
    %81 = arith.subf %79, %80 : vector<8x1xf32>
    %82 = vector.broadcast %77 : vector<8x1xf32> to vector<8x256xf32>
    %83 = arith.mulf %60, %82 : vector<8x256xf32>
    %84 = vector.broadcast %81 : vector<8x1xf32> to vector<8x256xf32>
    %85 = arith.addf %83, %84 : vector<8x256xf32>
    %86 = vector.shape_cast %4 : vector<8x1xi1> to vector<8x1xi1>
    %87 = vector.broadcast %86 : vector<8x1xi1> to vector<8x256xi1>
    %88 = arith.select %87, %85, %60 : vector<8x256xi1>, vector<8x256xf32>
    %cst_49 = arith.constant 1.000000e-01 : f32
    %89 = vector.broadcast %cst_49 : f32 to vector<8x256xf32>
    %90 = arith.mulf %89, %88 : vector<8x256xf32>
    %91 = arith.maximumf %88, %90 : vector<8x256xf32>
    %c0_50 = arith.constant 0 : index
    %c0_51 = arith.constant 0 : index
    %c0_52 = arith.constant 0 : index
    %92 = vector.load %arg9[%c0_50, %c0_51, %c0_52] : memref<2x8x72xf32, #tpu.memory_space<vmem>>, vector<1x8x72xf32>
    %93 = vector.shape_cast %92 : vector<1x8x72xf32> to vector<8x72xf32>
    %c0_53 = arith.constant 0 : index
    %c0_54 = arith.constant 0 : index
    %c0_55 = arith.constant 0 : index
    %94 = vector.load %arg10[%c0_53, %c0_54, %c0_55] : memref<2x8x1xf32, #tpu.memory_space<vmem>>, vector<1x8x1xf32>
    %95 = vector.shape_cast %94 : vector<1x8x1xf32> to vector<8x1xf32>
    %c17_i32_56 = arith.constant 17 : i32
    %96 = tpu.dynamic_rotate %91 by %c17_i32_56 dim 1 : vector<8x256xf32>, i32 -> vector<8x256xf32>
    %97 = vector.broadcast %5 : vector<1x256xf32> to vector<8x256xf32>
    %98 = arith.mulf %96, %97 : vector<8x256xf32>
    %c0_57 = arith.constant 0 : index
    %c0_58 = arith.constant 0 : index
    %99 = vector.load %arg16[%c0_57, %c0_58] : memref<72x256xf32, #tpu.memory_space<vmem>>, vector<8x256xf32>
    tpu.vector_store %arg16[%c0_57, %c0_58], %98 {strides = array<i32>} : memref<72x256xf32, #tpu.memory_space<vmem>>, vector<8x256xf32>,
    %c16_i32_59 = arith.constant 16 : i32
    %100 = tpu.dynamic_rotate %91 by %c16_i32_59 dim 1 : vector<8x256xf32>, i32 -> vector<8x256xf32>
    %101 = vector.broadcast %6 : vector<1x256xf32> to vector<8x256xf32>
    %102 = arith.mulf %100, %101 : vector<8x256xf32>
    %c8_60 = arith.constant 8 : index
    %c0_61 = arith.constant 0 : index
    %103 = vector.load %arg16[%c8_60, %c0_61] : memref<72x256xf32, #tpu.memory_space<vmem>>, vector<8x256xf32>
    tpu.vector_store %arg16[%c8_60, %c0_61], %102 {strides = array<i32>} : memref<72x256xf32, #tpu.memory_space<vmem>>, vector<8x256xf32>,
    %c15_i32_62 = arith.constant 15 : i32
    %104 = tpu.dynamic_rotate %91 by %c15_i32_62 dim 1 : vector<8x256xf32>, i32 -> vector<8x256xf32>
    %105 = vector.broadcast %7 : vector<1x256xf32> to vector<8x256xf32>
    %106 = arith.mulf %104, %105 : vector<8x256xf32>
    %c16_63 = arith.constant 16 : index
    %c0_64 = arith.constant 0 : index
    %107 = vector.load %arg16[%c16_63, %c0_64] : memref<72x256xf32, #tpu.memory_space<vmem>>, vector<8x256xf32>
    tpu.vector_store %arg16[%c16_63, %c0_64], %106 {strides = array<i32>} : memref<72x256xf32, #tpu.memory_space<vmem>>, vector<8x256xf32>,
    %c1_i32_65 = arith.constant 1 : i32
    %108 = tpu.dynamic_rotate %91 by %c1_i32_65 dim 1 : vector<8x256xf32>, i32 -> vector<8x256xf32>
    %109 = vector.broadcast %8 : vector<1x256xf32> to vector<8x256xf32>
    %110 = arith.mulf %108, %109 : vector<8x256xf32>
    %c24_66 = arith.constant 24 : index
    %c0_67 = arith.constant 0 : index
    %111 = vector.load %arg16[%c24_66, %c0_67] : memref<72x256xf32, #tpu.memory_space<vmem>>, vector<8x256xf32>
    tpu.vector_store %arg16[%c24_66, %c0_67], %110 {strides = array<i32>} : memref<72x256xf32, #tpu.memory_space<vmem>>, vector<8x256xf32>,
    %c32_68 = arith.constant 32 : index
    %c0_69 = arith.constant 0 : index
    %112 = vector.load %arg16[%c32_68, %c0_69] : memref<72x256xf32, #tpu.memory_space<vmem>>, vector<8x256xf32>
    tpu.vector_store %arg16[%c32_68, %c0_69], %91 {strides = array<i32>} : memref<72x256xf32, #tpu.memory_space<vmem>>, vector<8x256xf32>,
    %c255_i32_70 = arith.constant 255 : i32
    %113 = tpu.dynamic_rotate %91 by %c255_i32_70 dim 1 : vector<8x256xf32>, i32 -> vector<8x256xf32>
    %114 = vector.broadcast %9 : vector<1x256xf32> to vector<8x256xf32>
    %115 = arith.mulf %113, %114 : vector<8x256xf32>
    %c40_71 = arith.constant 40 : index
    %c0_72 = arith.constant 0 : index
    %116 = vector.load %arg16[%c40_71, %c0_72] : memref<72x256xf32, #tpu.memory_space<vmem>>, vector<8x256xf32>
    tpu.vector_store %arg16[%c40_71, %c0_72], %115 {strides = array<i32>} : memref<72x256xf32, #tpu.memory_space<vmem>>, vector<8x256xf32>,
    %c241_i32_73 = arith.constant 241 : i32
    %117 = tpu.dynamic_rotate %91 by %c241_i32_73 dim 1 : vector<8x256xf32>, i32 -> vector<8x256xf32>
    %118 = vector.broadcast %10 : vector<1x256xf32> to vector<8x256xf32>
    %119 = arith.mulf %117, %118 : vector<8x256xf32>
    %c48_74 = arith.constant 48 : index
    %c0_75 = arith.constant 0 : index
    %120 = vector.load %arg16[%c48_74, %c0_75] : memref<72x256xf32, #tpu.memory_space<vmem>>, vector<8x256xf32>
    tpu.vector_store %arg16[%c48_74, %c0_75], %119 {strides = array<i32>} : memref<72x256xf32, #tpu.memory_space<vmem>>, vector<8x256xf32>,
    %c240_i32_76 = arith.constant 240 : i32
    %121 = tpu.dynamic_rotate %91 by %c240_i32_76 dim 1 : vector<8x256xf32>, i32 -> vector<8x256xf32>
    %122 = vector.broadcast %11 : vector<1x256xf32> to vector<8x256xf32>
    %123 = arith.mulf %121, %122 : vector<8x256xf32>
    %c56_77 = arith.constant 56 : index
    %c0_78 = arith.constant 0 : index
    %124 = vector.load %arg16[%c56_77, %c0_78] : memref<72x256xf32, #tpu.memory_space<vmem>>, vector<8x256xf32>
    tpu.vector_store %arg16[%c56_77, %c0_78], %123 {strides = array<i32>} : memref<72x256xf32, #tpu.memory_space<vmem>>, vector<8x256xf32>,
    %c239_i32_79 = arith.constant 239 : i32
    %125 = tpu.dynamic_rotate %91 by %c239_i32_79 dim 1 : vector<8x256xf32>, i32 -> vector<8x256xf32>
    %126 = vector.broadcast %12 : vector<1x256xf32> to vector<8x256xf32>
    %127 = arith.mulf %125, %126 : vector<8x256xf32>
    %c64_80 = arith.constant 64 : index
    %c0_81 = arith.constant 0 : index
    %128 = vector.load %arg16[%c64_80, %c0_81] : memref<72x256xf32, #tpu.memory_space<vmem>>, vector<8x256xf32>
    tpu.vector_store %arg16[%c64_80, %c0_81], %127 {strides = array<i32>} : memref<72x256xf32, #tpu.memory_space<vmem>>, vector<8x256xf32>,
    %c0_82 = arith.constant 0 : index
    %c0_83 = arith.constant 0 : index
    %129 = vector.load %arg16[%c0_82, %c0_83] : memref<72x256xf32, #tpu.memory_space<vmem>>, vector<72x256xf32>
    %cst_84 = arith.constant dense<0.000000e+00> : vector<8x256xf32>
    %130 = tpu.matmul %93, %129, %cst_84 {dimension_numbers = #tpu.dot_dimension_numbers<[1], [0], [0], [1], [0, 0, 1, 1], [], []>} : vector<8x72xf32>, vector<72x256xf32>, vector<8x256xf32> -> vector<8x256xf32>
    %131 = vector.broadcast %95 : vector<8x1xf32> to vector<8x256xf32>
    %132 = arith.addf %130, %131 : vector<8x256xf32>
    %cst_85 = arith.constant 1.000000e-01 : f32
    %133 = vector.broadcast %cst_85 : f32 to vector<8x256xf32>
    %134 = arith.mulf %133, %132 : vector<8x256xf32>
    %135 = arith.maximumf %132, %134 : vector<8x256xf32>
    %c0_86 = arith.constant 0 : index
    %c0_87 = arith.constant 0 : index
    %c0_88 = arith.constant 0 : index
    %136 = vector.load %arg11[%c0_86, %c0_87, %c0_88] : memref<2x8x8xf32, #tpu.memory_space<vmem>>, vector<1x8x8xf32>
    %137 = vector.shape_cast %136 : vector<1x8x8xf32> to vector<8x8xf32>
    %cst_89 = arith.constant dense<0.000000e+00> : vector<8x256xf32>
    %138 = tpu.matmul %137, %18, %cst_89 {dimension_numbers = #tpu.dot_dimension_numbers<[1], [0], [0], [1], [0, 0, 1, 1], [], []>} : vector<8x8xf32>, vector<8x256xf32>, vector<8x256xf32> -> vector<8x256xf32>
    %c0_90 = arith.constant 0 : index
    %c0_91 = arith.constant 0 : index
    %c0_92 = arith.constant 0 : index
    %139 = vector.load %arg12[%c0_90, %c0_91, %c0_92] : memref<2x8x1xf32, #tpu.memory_space<vmem>>, vector<1x8x1xf32>
    %140 = vector.shape_cast %139 : vector<1x8x1xf32> to vector<8x1xf32>
    %141 = vector.broadcast %140 : vector<8x1xf32> to vector<8x256xf32>
    %142 = arith.addf %138, %141 : vector<8x256xf32>
    %143 = arith.addf %135, %142 : vector<8x256xf32>
    %144 = arith.subf %19, %143 : vector<8x256xf32>
    %c1_93 = arith.constant 1 : index
    %c0_94 = arith.constant 0 : index
    %c0_95 = arith.constant 0 : index
    %145 = vector.load %arg5[%c1_93, %c0_94, %c0_95] : memref<2x8x72xf32, #tpu.memory_space<vmem>>, vector<1x8x72xf32>
    %146 = vector.shape_cast %145 : vector<1x8x72xf32> to vector<8x72xf32>
    %c1_96 = arith.constant 1 : index
    %c0_97 = arith.constant 0 : index
    %c0_98 = arith.constant 0 : index
    %147 = vector.load %arg6[%c1_96, %c0_97, %c0_98] : memref<2x8x1xf32, #tpu.memory_space<vmem>>, vector<1x8x1xf32>
    %148 = vector.shape_cast %147 : vector<1x8x1xf32> to vector<8x1xf32>
    %c17_i32_99 = arith.constant 17 : i32
    %149 = tpu.dynamic_rotate %144 by %c17_i32_99 dim 1 : vector<8x256xf32>, i32 -> vector<8x256xf32>
    %150 = vector.broadcast %5 : vector<1x256xf32> to vector<8x256xf32>
    %151 = arith.mulf %149, %150 : vector<8x256xf32>
    %c0_100 = arith.constant 0 : index
    %c0_101 = arith.constant 0 : index
    %152 = vector.load %arg16[%c0_100, %c0_101] : memref<72x256xf32, #tpu.memory_space<vmem>>, vector<8x256xf32>
    tpu.vector_store %arg16[%c0_100, %c0_101], %151 {strides = array<i32>} : memref<72x256xf32, #tpu.memory_space<vmem>>, vector<8x256xf32>,
    %c16_i32_102 = arith.constant 16 : i32
    %153 = tpu.dynamic_rotate %144 by %c16_i32_102 dim 1 : vector<8x256xf32>, i32 -> vector<8x256xf32>
    %154 = vector.broadcast %6 : vector<1x256xf32> to vector<8x256xf32>
    %155 = arith.mulf %153, %154 : vector<8x256xf32>
    %c8_103 = arith.constant 8 : index
    %c0_104 = arith.constant 0 : index
    %156 = vector.load %arg16[%c8_103, %c0_104] : memref<72x256xf32, #tpu.memory_space<vmem>>, vector<8x256xf32>
    tpu.vector_store %arg16[%c8_103, %c0_104], %155 {strides = array<i32>} : memref<72x256xf32, #tpu.memory_space<vmem>>, vector<8x256xf32>,
    %c15_i32_105 = arith.constant 15 : i32
    %157 = tpu.dynamic_rotate %144 by %c15_i32_105 dim 1 : vector<8x256xf32>, i32 -> vector<8x256xf32>
    %158 = vector.broadcast %7 : vector<1x256xf32> to vector<8x256xf32>
    %159 = arith.mulf %157, %158 : vector<8x256xf32>
    %c16_106 = arith.constant 16 : index
    %c0_107 = arith.constant 0 : index
    %160 = vector.load %arg16[%c16_106, %c0_107] : memref<72x256xf32, #tpu.memory_space<vmem>>, vector<8x256xf32>
    tpu.vector_store %arg16[%c16_106, %c0_107], %159 {strides = array<i32>} : memref<72x256xf32, #tpu.memory_space<vmem>>, vector<8x256xf32>,
    %c1_i32_108 = arith.constant 1 : i32
    %161 = tpu.dynamic_rotate %144 by %c1_i32_108 dim 1 : vector<8x256xf32>, i32 -> vector<8x256xf32>
    %162 = vector.broadcast %8 : vector<1x256xf32> to vector<8x256xf32>
    %163 = arith.mulf %161, %162 : vector<8x256xf32>
    %c24_109 = arith.constant 24 : index
    %c0_110 = arith.constant 0 : index
    %164 = vector.load %arg16[%c24_109, %c0_110] : memref<72x256xf32, #tpu.memory_space<vmem>>, vector<8x256xf32>
    tpu.vector_store %arg16[%c24_109, %c0_110], %163 {strides = array<i32>} : memref<72x256xf32, #tpu.memory_space<vmem>>, vector<8x256xf32>,
    %c32_111 = arith.constant 32 : index
    %c0_112 = arith.constant 0 : index
    %165 = vector.load %arg16[%c32_111, %c0_112] : memref<72x256xf32, #tpu.memory_space<vmem>>, vector<8x256xf32>
    tpu.vector_store %arg16[%c32_111, %c0_112], %144 {strides = array<i32>} : memref<72x256xf32, #tpu.memory_space<vmem>>, vector<8x256xf32>,
    %c255_i32_113 = arith.constant 255 : i32
    %166 = tpu.dynamic_rotate %144 by %c255_i32_113 dim 1 : vector<8x256xf32>, i32 -> vector<8x256xf32>
    %167 = vector.broadcast %9 : vector<1x256xf32> to vector<8x256xf32>
    %168 = arith.mulf %166, %167 : vector<8x256xf32>
    %c40_114 = arith.constant 40 : index
    %c0_115 = arith.constant 0 : index
    %169 = vector.load %arg16[%c40_114, %c0_115] : memref<72x256xf32, #tpu.memory_space<vmem>>, vector<8x256xf32>
    tpu.vector_store %arg16[%c40_114, %c0_115], %168 {strides = array<i32>} : memref<72x256xf32, #tpu.memory_space<vmem>>, vector<8x256xf32>,
    %c241_i32_116 = arith.constant 241 : i32
    %170 = tpu.dynamic_rotate %144 by %c241_i32_116 dim 1 : vector<8x256xf32>, i32 -> vector<8x256xf32>
    %171 = vector.broadcast %10 : vector<1x256xf32> to vector<8x256xf32>
    %172 = arith.mulf %170, %171 : vector<8x256xf32>
    %c48_117 = arith.constant 48 : index
    %c0_118 = arith.constant 0 : index
    %173 = vector.load %arg16[%c48_117, %c0_118] : memref<72x256xf32, #tpu.memory_space<vmem>>, vector<8x256xf32>
    tpu.vector_store %arg16[%c48_117, %c0_118], %172 {strides = array<i32>} : memref<72x256xf32, #tpu.memory_space<vmem>>, vector<8x256xf32>,
    %c240_i32_119 = arith.constant 240 : i32
    %174 = tpu.dynamic_rotate %144 by %c240_i32_119 dim 1 : vector<8x256xf32>, i32 -> vector<8x256xf32>
    %175 = vector.broadcast %11 : vector<1x256xf32> to vector<8x256xf32>
    %176 = arith.mulf %174, %175 : vector<8x256xf32>
    %c56_120 = arith.constant 56 : index
    %c0_121 = arith.constant 0 : index
    %177 = vector.load %arg16[%c56_120, %c0_121] : memref<72x256xf32, #tpu.memory_space<vmem>>, vector<8x256xf32>
    tpu.vector_store %arg16[%c56_120, %c0_121], %176 {strides = array<i32>} : memref<72x256xf32, #tpu.memory_space<vmem>>, vector<8x256xf32>,
    %c239_i32_122 = arith.constant 239 : i32
    %178 = tpu.dynamic_rotate %144 by %c239_i32_122 dim 1 : vector<8x256xf32>, i32 -> vector<8x256xf32>
    %179 = vector.broadcast %12 : vector<1x256xf32> to vector<8x256xf32>
    %180 = arith.mulf %178, %179 : vector<8x256xf32>
    %c64_123 = arith.constant 64 : index
    %c0_124 = arith.constant 0 : index
    %181 = vector.load %arg16[%c64_123, %c0_124] : memref<72x256xf32, #tpu.memory_space<vmem>>, vector<8x256xf32>
    tpu.vector_store %arg16[%c64_123, %c0_124], %180 {strides = array<i32>} : memref<72x256xf32, #tpu.memory_space<vmem>>, vector<8x256xf32>,
    %c0_125 = arith.constant 0 : index
    %c0_126 = arith.constant 0 : index
    %182 = vector.load %arg16[%c0_125, %c0_126] : memref<72x256xf32, #tpu.memory_space<vmem>>, vector<72x256xf32>
    %cst_127 = arith.constant dense<0.000000e+00> : vector<8x256xf32>
    %183 = tpu.matmul %146, %182, %cst_127 {dimension_numbers = #tpu.dot_dimension_numbers<[1], [0], [0], [1], [0, 0, 1, 1], [], []>} : vector<8x72xf32>, vector<72x256xf32>, vector<8x256xf32> -> vector<8x256xf32>
    %184 = vector.broadcast %148 : vector<8x1xf32> to vector<8x256xf32>
    %185 = arith.addf %183, %184 : vector<8x256xf32>
    %cst_128 = arith.constant dense<0.000000e+00> : vector<8xf32>
    %186 = vector.multi_reduction <add>, %185, %cst_128 [1] : vector<8x256xf32> to vector<8xf32>
    %187 = vector.shape_cast %186 : vector<8xf32> to vector<8x1xf32>
    %cst_129 = arith.constant 2.560000e+02 : f32
    %188 = vector.broadcast %cst_129 : f32 to vector<8x1xf32>
    %189 = arith.divf %187, %188 : vector<8x1xf32>
    %190 = arith.mulf %185, %185 : vector<8x256xf32>
    %cst_130 = arith.constant dense<0.000000e+00> : vector<8xf32>
    %191 = vector.multi_reduction <add>, %190, %cst_130 [1] : vector<8x256xf32> to vector<8xf32>
    %192 = vector.shape_cast %191 : vector<8xf32> to vector<8x1xf32>
    %cst_131 = arith.constant 2.560000e+02 : f32
    %193 = vector.broadcast %cst_131 : f32 to vector<8x1xf32>
    %194 = arith.divf %192, %193 : vector<8x1xf32>
    %195 = arith.mulf %189, %189 : vector<8x1xf32>
    %196 = arith.subf %194, %195 : vector<8x1xf32>
    %c1_132 = arith.constant 1 : index
    %c0_133 = arith.constant 0 : index
    %c0_134 = arith.constant 0 : index
    %197 = vector.load %arg7[%c1_132, %c0_133, %c0_134] : memref<2x8x1xf32, #tpu.memory_space<vmem>>, vector<1x8x1xf32>
    %198 = vector.shape_cast %197 : vector<1x8x1xf32> to vector<8x1xf32>
    %cst_135 = arith.constant 9.99999974E-6 : f32
    %199 = vector.broadcast %cst_135 : f32 to vector<8x1xf32>
    %200 = arith.addf %196, %199 : vector<8x1xf32>
    %201 = math.rsqrt %200 : vector<8x1xf32>
    %202 = arith.mulf %198, %201 : vector<8x1xf32>
    %c1_136 = arith.constant 1 : index
    %c0_137 = arith.constant 0 : index
    %c0_138 = arith.constant 0 : index
    %203 = vector.load %arg8[%c1_136, %c0_137, %c0_138] : memref<2x8x1xf32, #tpu.memory_space<vmem>>, vector<1x8x1xf32>
    %204 = vector.shape_cast %203 : vector<1x8x1xf32> to vector<8x1xf32>
    %205 = arith.mulf %189, %202 : vector<8x1xf32>
    %206 = arith.subf %204, %205 : vector<8x1xf32>
    %207 = vector.broadcast %202 : vector<8x1xf32> to vector<8x256xf32>
    %208 = arith.mulf %185, %207 : vector<8x256xf32>
    %209 = vector.broadcast %206 : vector<8x1xf32> to vector<8x256xf32>
    %210 = arith.addf %208, %209 : vector<8x256xf32>
    %211 = vector.shape_cast %4 : vector<8x1xi1> to vector<8x1xi1>
    %212 = vector.broadcast %211 : vector<8x1xi1> to vector<8x256xi1>
    %213 = arith.select %212, %210, %185 : vector<8x256xi1>, vector<8x256xf32>
    %cst_139 = arith.constant 1.000000e-01 : f32
    %214 = vector.broadcast %cst_139 : f32 to vector<8x256xf32>
    %215 = arith.mulf %214, %213 : vector<8x256xf32>
    %216 = arith.maximumf %213, %215 : vector<8x256xf32>
    %c1_140 = arith.constant 1 : index
    %c0_141 = arith.constant 0 : index
    %c0_142 = arith.constant 0 : index
    %217 = vector.load %arg9[%c1_140, %c0_141, %c0_142] : memref<2x8x72xf32, #tpu.memory_space<vmem>>, vector<1x8x72xf32>
    %218 = vector.shape_cast %217 : vector<1x8x72xf32> to vector<8x72xf32>
    %c1_143 = arith.constant 1 : index
    %c0_144 = arith.constant 0 : index
    %c0_145 = arith.constant 0 : index
    %219 = vector.load %arg10[%c1_143, %c0_144, %c0_145] : memref<2x8x1xf32, #tpu.memory_space<vmem>>, vector<1x8x1xf32>
    %220 = vector.shape_cast %219 : vector<1x8x1xf32> to vector<8x1xf32>
    %c17_i32_146 = arith.constant 17 : i32
    %221 = tpu.dynamic_rotate %216 by %c17_i32_146 dim 1 : vector<8x256xf32>, i32 -> vector<8x256xf32>
    %222 = vector.broadcast %5 : vector<1x256xf32> to vector<8x256xf32>
    %223 = arith.mulf %221, %222 : vector<8x256xf32>
    %c0_147 = arith.constant 0 : index
    %c0_148 = arith.constant 0 : index
    %224 = vector.load %arg16[%c0_147, %c0_148] : memref<72x256xf32, #tpu.memory_space<vmem>>, vector<8x256xf32>
    tpu.vector_store %arg16[%c0_147, %c0_148], %223 {strides = array<i32>} : memref<72x256xf32, #tpu.memory_space<vmem>>, vector<8x256xf32>,
    %c16_i32_149 = arith.constant 16 : i32
    %225 = tpu.dynamic_rotate %216 by %c16_i32_149 dim 1 : vector<8x256xf32>, i32 -> vector<8x256xf32>
    %226 = vector.broadcast %6 : vector<1x256xf32> to vector<8x256xf32>
    %227 = arith.mulf %225, %226 : vector<8x256xf32>
    %c8_150 = arith.constant 8 : index
    %c0_151 = arith.constant 0 : index
    %228 = vector.load %arg16[%c8_150, %c0_151] : memref<72x256xf32, #tpu.memory_space<vmem>>, vector<8x256xf32>
    tpu.vector_store %arg16[%c8_150, %c0_151], %227 {strides = array<i32>} : memref<72x256xf32, #tpu.memory_space<vmem>>, vector<8x256xf32>,
    %c15_i32_152 = arith.constant 15 : i32
    %229 = tpu.dynamic_rotate %216 by %c15_i32_152 dim 1 : vector<8x256xf32>, i32 -> vector<8x256xf32>
    %230 = vector.broadcast %7 : vector<1x256xf32> to vector<8x256xf32>
    %231 = arith.mulf %229, %230 : vector<8x256xf32>
    %c16_153 = arith.constant 16 : index
    %c0_154 = arith.constant 0 : index
    %232 = vector.load %arg16[%c16_153, %c0_154] : memref<72x256xf32, #tpu.memory_space<vmem>>, vector<8x256xf32>
    tpu.vector_store %arg16[%c16_153, %c0_154], %231 {strides = array<i32>} : memref<72x256xf32, #tpu.memory_space<vmem>>, vector<8x256xf32>,
    %c1_i32_155 = arith.constant 1 : i32
    %233 = tpu.dynamic_rotate %216 by %c1_i32_155 dim 1 : vector<8x256xf32>, i32 -> vector<8x256xf32>
    %234 = vector.broadcast %8 : vector<1x256xf32> to vector<8x256xf32>
    %235 = arith.mulf %233, %234 : vector<8x256xf32>
    %c24_156 = arith.constant 24 : index
    %c0_157 = arith.constant 0 : index
    %236 = vector.load %arg16[%c24_156, %c0_157] : memref<72x256xf32, #tpu.memory_space<vmem>>, vector<8x256xf32>
    tpu.vector_store %arg16[%c24_156, %c0_157], %235 {strides = array<i32>} : memref<72x256xf32, #tpu.memory_space<vmem>>, vector<8x256xf32>,
    %c32_158 = arith.constant 32 : index
    %c0_159 = arith.constant 0 : index
    %237 = vector.load %arg16[%c32_158, %c0_159] : memref<72x256xf32, #tpu.memory_space<vmem>>, vector<8x256xf32>
    tpu.vector_store %arg16[%c32_158, %c0_159], %216 {strides = array<i32>} : memref<72x256xf32, #tpu.memory_space<vmem>>, vector<8x256xf32>,
    %c255_i32_160 = arith.constant 255 : i32
    %238 = tpu.dynamic_rotate %216 by %c255_i32_160 dim 1 : vector<8x256xf32>, i32 -> vector<8x256xf32>
    %239 = vector.broadcast %9 : vector<1x256xf32> to vector<8x256xf32>
    %240 = arith.mulf %238, %239 : vector<8x256xf32>
    %c40_161 = arith.constant 40 : index
    %c0_162 = arith.constant 0 : index
    %241 = vector.load %arg16[%c40_161, %c0_162] : memref<72x256xf32, #tpu.memory_space<vmem>>, vector<8x256xf32>
    tpu.vector_store %arg16[%c40_161, %c0_162], %240 {strides = array<i32>} : memref<72x256xf32, #tpu.memory_space<vmem>>, vector<8x256xf32>,
    %c241_i32_163 = arith.constant 241 : i32
    %242 = tpu.dynamic_rotate %216 by %c241_i32_163 dim 1 : vector<8x256xf32>, i32 -> vector<8x256xf32>
    %243 = vector.broadcast %10 : vector<1x256xf32> to vector<8x256xf32>
    %244 = arith.mulf %242, %243 : vector<8x256xf32>
    %c48_164 = arith.constant 48 : index
    %c0_165 = arith.constant 0 : index
    %245 = vector.load %arg16[%c48_164, %c0_165] : memref<72x256xf32, #tpu.memory_space<vmem>>, vector<8x256xf32>
    tpu.vector_store %arg16[%c48_164, %c0_165], %244 {strides = array<i32>} : memref<72x256xf32, #tpu.memory_space<vmem>>, vector<8x256xf32>,
    %c240_i32_166 = arith.constant 240 : i32
    %246 = tpu.dynamic_rotate %216 by %c240_i32_166 dim 1 : vector<8x256xf32>, i32 -> vector<8x256xf32>
    %247 = vector.broadcast %11 : vector<1x256xf32> to vector<8x256xf32>
    %248 = arith.mulf %246, %247 : vector<8x256xf32>
    %c56_167 = arith.constant 56 : index
    %c0_168 = arith.constant 0 : index
    %249 = vector.load %arg16[%c56_167, %c0_168] : memref<72x256xf32, #tpu.memory_space<vmem>>, vector<8x256xf32>
    tpu.vector_store %arg16[%c56_167, %c0_168], %248 {strides = array<i32>} : memref<72x256xf32, #tpu.memory_space<vmem>>, vector<8x256xf32>,
    %c239_i32_169 = arith.constant 239 : i32
    %250 = tpu.dynamic_rotate %216 by %c239_i32_169 dim 1 : vector<8x256xf32>, i32 -> vector<8x256xf32>
    %251 = vector.broadcast %12 : vector<1x256xf32> to vector<8x256xf32>
    %252 = arith.mulf %250, %251 : vector<8x256xf32>
    %c64_170 = arith.constant 64 : index
    %c0_171 = arith.constant 0 : index
    %253 = vector.load %arg16[%c64_170, %c0_171] : memref<72x256xf32, #tpu.memory_space<vmem>>, vector<8x256xf32>
    tpu.vector_store %arg16[%c64_170, %c0_171], %252 {strides = array<i32>} : memref<72x256xf32, #tpu.memory_space<vmem>>, vector<8x256xf32>,
    %c0_172 = arith.constant 0 : index
    %c0_173 = arith.constant 0 : index
    %254 = vector.load %arg16[%c0_172, %c0_173] : memref<72x256xf32, #tpu.memory_space<vmem>>, vector<72x256xf32>
    %cst_174 = arith.constant dense<0.000000e+00> : vector<8x256xf32>
    %255 = tpu.matmul %218, %254, %cst_174 {dimension_numbers = #tpu.dot_dimension_numbers<[1], [0], [0], [1], [0, 0, 1, 1], [], []>} : vector<8x72xf32>, vector<72x256xf32>, vector<8x256xf32> -> vector<8x256xf32>
    %256 = vector.broadcast %220 : vector<8x1xf32> to vector<8x256xf32>
    %257 = arith.addf %255, %256 : vector<8x256xf32>
    %cst_175 = arith.constant 1.000000e-01 : f32
    %258 = vector.broadcast %cst_175 : f32 to vector<8x256xf32>
    %259 = arith.mulf %258, %257 : vector<8x256xf32>
    %260 = arith.maximumf %257, %259 : vector<8x256xf32>
    %c1_176 = arith.constant 1 : index
    %c0_177 = arith.constant 0 : index
    %c0_178 = arith.constant 0 : index
    %261 = vector.load %arg11[%c1_176, %c0_177, %c0_178] : memref<2x8x8xf32, #tpu.memory_space<vmem>>, vector<1x8x8xf32>
    %262 = vector.shape_cast %261 : vector<1x8x8xf32> to vector<8x8xf32>
    %cst_179 = arith.constant dense<0.000000e+00> : vector<8x256xf32>
    %263 = tpu.matmul %262, %144, %cst_179 {dimension_numbers = #tpu.dot_dimension_numbers<[1], [0], [0], [1], [0, 0, 1, 1], [], []>} : vector<8x8xf32>, vector<8x256xf32>, vector<8x256xf32> -> vector<8x256xf32>
    %c1_180 = arith.constant 1 : index
    %c0_181 = arith.constant 0 : index
    %c0_182 = arith.constant 0 : index
    %264 = vector.load %arg12[%c1_180, %c0_181, %c0_182] : memref<2x8x1xf32, #tpu.memory_space<vmem>>, vector<1x8x1xf32>
    %265 = vector.shape_cast %264 : vector<1x8x1xf32> to vector<8x1xf32>
    %266 = vector.broadcast %265 : vector<8x1xf32> to vector<8x256xf32>
    %267 = arith.addf %263, %266 : vector<8x256xf32>
    %268 = arith.addf %260, %267 : vector<8x256xf32>
    %269 = arith.addf %18, %268 : vector<8x256xf32>
    %cst_183 = arith.constant 5.000000e-01 : f32
    %270 = vector.broadcast %cst_183 : f32 to vector<8x256xf32>
    %271 = arith.mulf %270, %269 : vector<8x256xf32>
    %272 = math.tanh %271 : vector<8x256xf32>
    %cst_184 = arith.constant 5.000000e-01 : f32
    %273 = vector.broadcast %cst_184 : f32 to vector<8x256xf32>
    %274 = arith.mulf %273, %272 : vector<8x256xf32>
    %cst_185 = arith.constant 5.000000e-01 : f32
    %275 = vector.broadcast %cst_185 : f32 to vector<8x256xf32>
    %276 = arith.addf %274, %275 : vector<8x256xf32>
    %c0_186 = arith.constant 0 : index
    %c0_187 = arith.constant 0 : index
    %c0_188 = arith.constant 0 : index
    %277 = vector.load %arg14[%c0_186, %c0_187, %c0_188] : memref<1x8x256xf32, #tpu.memory_space<vmem>>, vector<1x8x256xf32>
    %278 = vector.shape_cast %277 : vector<1x8x256xf32> to vector<8x256xf32>
    %279 = vector.shape_cast %276 : vector<8x256xf32> to vector<1x8x256xf32>
    tpu.vector_store %arg14[%c0_186, %c0_187, %c0_188], %279 {strides = array<i32>} : memref<1x8x256xf32, #tpu.memory_space<vmem>>, vector<1x8x256xf32>,
    %cst_189 = arith.constant 5.000000e-01 : f32
    %280 = vector.broadcast %cst_189 : f32 to vector<8x256xf32>
    %281 = arith.mulf %280, %144 : vector<8x256xf32>
    %282 = math.tanh %281 : vector<8x256xf32>
    %cst_190 = arith.constant 5.000000e-01 : f32
    %283 = vector.broadcast %cst_190 : f32 to vector<8x256xf32>
    %284 = arith.mulf %283, %282 : vector<8x256xf32>
    %cst_191 = arith.constant 5.000000e-01 : f32
    %285 = vector.broadcast %cst_191 : f32 to vector<8x256xf32>
    %286 = arith.addf %284, %285 : vector<8x256xf32>
    %c0_192 = arith.constant 0 : index
    %c0_193 = arith.constant 0 : index
    %c0_194 = arith.constant 0 : index
    %287 = vector.load %arg15[%c0_192, %c0_193, %c0_194] : memref<1x8x256xf32, #tpu.memory_space<vmem>>, vector<1x8x256xf32>
    %288 = vector.shape_cast %287 : vector<1x8x256xf32> to vector<8x256xf32>
    %289 = vector.shape_cast %286 : vector<8x256xf32> to vector<1x8x256xf32>
    tpu.vector_store %arg15[%c0_192, %c0_193, %c0_194], %289 {strides = array<i32>} : memref<1x8x256xf32, #tpu.memory_space<vmem>>, vector<1x8x256xf32>,
    return
  }
  func.func @transform_0(%arg0: i32) -> (i32, i32, i32) {
    %c0_i32 = arith.constant 0 : i32
    %c0_i32_0 = arith.constant 0 : i32
    %c0_i32_1 = arith.constant 0 : i32
    return %arg0, %c0_i32, %c0_i32_0 : i32, i32, i32
  }
  func.func @transform_1(%arg0: i32) -> (i32, i32) {
    %c0_i32 = arith.constant 0 : i32
    %c0_i32_0 = arith.constant 0 : i32
    %c0_i32_1 = arith.constant 0 : i32
    return %c0_i32, %c0_i32_0 : i32, i32
  }
  func.func @transform_2(%arg0: i32) -> (i32, i32) {
    %c0_i32 = arith.constant 0 : i32
    %c0_i32_0 = arith.constant 0 : i32
    %c0_i32_1 = arith.constant 0 : i32
    return %c0_i32, %c0_i32_0 : i32, i32
  }
  func.func @transform_3(%arg0: i32) -> (i32, i32) {
    %c0_i32 = arith.constant 0 : i32
    %c0_i32_0 = arith.constant 0 : i32
    %c0_i32_1 = arith.constant 0 : i32
    return %c0_i32, %c0_i32_0 : i32, i32
  }
  func.func @transform_4(%arg0: i32) -> (i32, i32, i32) {
    %c0_i32 = arith.constant 0 : i32
    %c0_i32_0 = arith.constant 0 : i32
    %c0_i32_1 = arith.constant 0 : i32
    %c0_i32_2 = arith.constant 0 : i32
    return %c0_i32, %c0_i32_0, %c0_i32_1 : i32, i32, i32
  }
  func.func @transform_5(%arg0: i32) -> (i32, i32, i32) {
    %c0_i32 = arith.constant 0 : i32
    %c0_i32_0 = arith.constant 0 : i32
    %c0_i32_1 = arith.constant 0 : i32
    %c0_i32_2 = arith.constant 0 : i32
    return %c0_i32, %c0_i32_0, %c0_i32_1 : i32, i32, i32
  }
  func.func @transform_6(%arg0: i32) -> (i32, i32, i32) {
    %c0_i32 = arith.constant 0 : i32
    %c0_i32_0 = arith.constant 0 : i32
    %c0_i32_1 = arith.constant 0 : i32
    %c0_i32_2 = arith.constant 0 : i32
    return %c0_i32, %c0_i32_0, %c0_i32_1 : i32, i32, i32
  }
  func.func @transform_7(%arg0: i32) -> (i32, i32, i32) {
    %c0_i32 = arith.constant 0 : i32
    %c0_i32_0 = arith.constant 0 : i32
    %c0_i32_1 = arith.constant 0 : i32
    %c0_i32_2 = arith.constant 0 : i32
    return %c0_i32, %c0_i32_0, %c0_i32_1 : i32, i32, i32
  }
  func.func @transform_8(%arg0: i32) -> (i32, i32, i32) {
    %c0_i32 = arith.constant 0 : i32
    %c0_i32_0 = arith.constant 0 : i32
    %c0_i32_1 = arith.constant 0 : i32
    %c0_i32_2 = arith.constant 0 : i32
    return %c0_i32, %c0_i32_0, %c0_i32_1 : i32, i32, i32
  }
  func.func @transform_9(%arg0: i32) -> (i32, i32, i32) {
    %c0_i32 = arith.constant 0 : i32
    %c0_i32_0 = arith.constant 0 : i32
    %c0_i32_1 = arith.constant 0 : i32
    %c0_i32_2 = arith.constant 0 : i32
    return %c0_i32, %c0_i32_0, %c0_i32_1 : i32, i32, i32
  }
  func.func @transform_10(%arg0: i32) -> (i32, i32, i32) {
    %c0_i32 = arith.constant 0 : i32
    %c0_i32_0 = arith.constant 0 : i32
    %c0_i32_1 = arith.constant 0 : i32
    %c0_i32_2 = arith.constant 0 : i32
    return %c0_i32, %c0_i32_0, %c0_i32_1 : i32, i32, i32
  }
  func.func @transform_11(%arg0: i32) -> (i32, i32, i32) {
    %c0_i32 = arith.constant 0 : i32
    %c0_i32_0 = arith.constant 0 : i32
    %c0_i32_1 = arith.constant 0 : i32
    %c0_i32_2 = arith.constant 0 : i32
    return %c0_i32, %c0_i32_0, %c0_i32_1 : i32, i32, i32
  }
  func.func @transform_12(%arg0: i32) -> (i32, i32) {
    %c0_i32 = arith.constant 0 : i32
    %c0_i32_0 = arith.constant 0 : i32
    %c0_i32_1 = arith.constant 0 : i32
    return %c0_i32, %c0_i32_0 : i32, i32
  }
  func.func @transform_13(%arg0: i32) -> (i32, i32, i32) {
    %c0_i32 = arith.constant 0 : i32
    %c0_i32_0 = arith.constant 0 : i32
    %c0_i32_1 = arith.constant 0 : i32
    return %arg0, %c0_i32, %c0_i32_0 : i32, i32, i32
  }
  func.func @transform_14(%arg0: i32) -> (i32, i32, i32) {
    %c0_i32 = arith.constant 0 : i32
    %c0_i32_0 = arith.constant 0 : i32
    %c0_i32_1 = arith.constant 0 : i32
    return %arg0, %c0_i32, %c0_i32_0 : i32, i32, i32
  }
}

</mosaic_0001>

<bundles_post_ra>
// kernel: inv_split_forward.1
= control target key start
LH: loop header
LB: loop body
LE: loop exit
PB: predicated region body
PF: predicated region fallthrough
CT: control target
= control target key end

     0   :  { %v1331_v2 = vmov 0.0   ;;  %vm79_vm0 = vcmask 64512   ;;  %v1332_v4 = vmov 0   ;;  %s1334_s21 = smov 111   ;;  %s1335_s22 = smov 113   ;;  %v169_v14 = vlaneseq  ;;  %s1943_s0 = inlined_call_operand.vmem [shape: f32[1,8,256], index: 0, kind: input, shape index: {}]   ;;  %s1944_s2 = inlined_call_operand.vmem [shape: f32[16,8], index: 2, kind: input, shape index: {}]   ;;  %s1945_s3 = inlined_call_operand.vmem [shape: f32[16,1], index: 3, kind: input, shape index: {}]   ;;  %s1946_s5 = inlined_call_operand.vmem [shape: f32[2,8,1], index: 5, kind: input, shape index: {}]   ;;  %s1947_s1 = inlined_call_operand.vmem [shape: f32[9,256], index: 1, kind: input, shape index: {}]   ;;  %s1948_s4 = inlined_call_operand.vmem [shape: f32[2,8,72], index: 4, kind: input, shape index: {}]   ;;  %s1949_s10 = inlined_call_operand.vmem [shape: f32[2,8,8], index: 10, kind: input, shape index: {}]   ;;  %s1950_s6 = inlined_call_operand.vmem [shape: f32[2,8,1], index: 6, kind: input, shape index: {}]   ;;  %s1951_s12 = inlined_call_operand.vmem [shape: f32[8,1], index: 12, kind: input, shape index: {}]   ;;  %s1952_s7 = inlined_call_operand.vmem [shape: f32[2,8,1], index: 7, kind: input, shape index: {}]   ;;  %s1953_s11 = inlined_call_operand.vmem [shape: f32[2,8,1], index: 11, kind: input, shape index: {}]   ;;  %s1954_s9 = inlined_call_operand.vmem [shape: f32[2,8,1], index: 9, kind: input, shape index: {}]   ;;  %s1955_s8 = inlined_call_operand.vmem [shape: f32[2,8,72], index: 8, kind: input, shape index: {}]   ;;  %s1956_s14 = inlined_call_operand.vmem [shape: f32[1,8,256], index: 14, kind: output, shape index: {1}]   ;;  %s1957_s13 = inlined_call_operand.vmem [shape: f32[1,8,256], index: 13, kind: output, shape index: {0}]  }
   0x1   :  { %v47_v0 = vld [vmem:[%s1943_s0 + $0x8] sm:$0xff]  ;;  %v46_v1 = vld [vmem:[%s1943_s0] sm:$0xff]  ;;  %150 = vmatprep.mubr.f32.mxu0 %v1331_v2  ;;  %1317 = vset.pattern.permute.xlu0 %v1332_v4  ;;  %s1333_s0 = smov 112   ;;  %s1336_s23 = smov 127   ;;  %vm368_vm9 = vcmask 588800  }
   0x2   :  { %v65_v3 = vld [vmem:[%s1944_s2] sm:$0xff]  ;;  %116 = vmatprep.subr.mxu0 %v47_v0  ;;  %436 = vmatprep.mubr.f32.mxu1 %v1331_v2  ;;  %s1337_s24 = smov 1   ;;  %s1338_s25 = smov 15   ;;  %v176_v16 = vshrl.u32 %v169_v14, 7  ;;  %v1473_v18 = vand.u32 127, %v169_v14 }
   0x3   :  { %v67_v5 = vld [vmem:[%s1945_s3] sm:$0xff]  ;;  %117 = vmatpush1.msra.mxu0 %v46_v1  ;;  %1318 = vset.pattern.permute.xlu1 %v1332_v4  ;;  %s1339_s26 = smov 16   ;;  %s1340_s27 = smov 17   ;;  %v1290_v19 = vld [vmem:[%s1947_s1 + $0x10] ss:$8 sm:$0x3] }
   0x4   :  { %71 = vperm.xlu0 %1317, %v67_v5   ;;  %1291 = vmatmul.mubr.msk.f32.vlgmr.msra.gmra.mxu0 %vm79_vm0, %v65_v3  ;;  %v164_v11 = vld [vmem:[%s1946_s5] sm:$0xff]  ;;  %v1478_v20 = vsub.s32 0, %v176_v16  ;;  %v1480_v21 = vsub.s32 1, %v176_v16  ;;  %vm305_vm1 = vcmp.lt.s32.totalorder %v1473_v18, 112  ;;  %vm327_vm2 = vcmp.lt.s32.totalorder %v1473_v18, 111 }
   0x5   :  { %156 = vmatprep.mubr.f32.mxu0 %v1331_v2  ;;  %v1289_v24 = vld [vmem:[%s1947_s1 + $0x7] ss:$8 sm:$0x3]  ;;  %v1288_v25 = vld [vmem:[%s1947_s1 + $0x6] ss:$8 sm:$0x3] }
   0x6   :  { %v1491_v26 = vrot.slane %v1290_v19, %v1480_v21  ;;  %v1494_v27 = vrot.slane %v1290_v19, %v1478_v20  ;;  %v1497_v28 = vrot.slane %v1289_v24, %v1478_v20  ;;  %v1500_v29 = vrot.slane %v1289_v24, %v1480_v21  ;;  %v1287_v35 = vld [vmem:[%s1947_s1 + $0x5] ss:$8 sm:$0x3]  ;;  %v1286_v50 = vld [vmem:[%s1947_s1 + $0x3] ss:$8 sm:$0x3] }
   0x7   :  { %vm283_vm3 = vcmp.lt.s32.totalorder %v1473_v18, 113  ;;  %v1506_v33 = vrot.slane %v1288_v25, %v1480_v21  ;;  %vm261_vm4 = vcmp.lt.s32.totalorder %v1473_v18, 127  ;;  %v1521_v40 = vrot.slane %v1288_v25, %v1478_v20  ;;  %v1285_v54 = vld [vmem:[%s1947_s1 + $0x2] ss:$8 sm:$0x3] }
   0x8   :  { %v1529_v44 = vrot.slane %v1287_v35, %v1480_v21  ;;  %v1533_v48 = vrot.slane %v1287_v35, %v1478_v20  ;;  %vm237_vm5 = vcmp.lt.s32.totalorder %v1473_v18, 1  ;;  %v1550_v56 = vrot.slane %v1286_v50, %v1480_v21  ;;  %v1284_v62 = vld [vmem:[%s1947_s1 + $0x1] ss:$8 sm:$0x3] }
   0x9   :  { %vm215_vm6 = vcmp.lt.s32.totalorder %v1473_v18, 15  ;;  %v1555_v60 = vrot.slane %v1286_v50, %v1478_v20  ;;  %v1565_v0 = vrot.slane %v1285_v54, %v1480_v21  ;;  %vm193_vm7 = vcmp.lt.s32.totalorder %v1473_v18, 16  ;;  %v50_v5 = vld [vmem:[%s1947_s1] ss:$8 sm:$0x3] }
   0xa   :  { %v1569_v1 = vrot.slane %v1285_v54, %v1478_v20  ;;  %v1585_v14 = vrot.slane %v1284_v62, %v1478_v20  ;;  %vm171_vm8 = vcmp.lt.s32.totalorder %v1473_v18, 17  ;;  %v1595_v19 = vrot.slane %v50_v5, %v1478_v20  ;;  %v163_v35 = vld [vmem:[%s1948_s4] sm:$0xff] }
  0x7f   :  { %v72_v6 = vpop.permute.xlu0 %71 }
  0xc4   :  { %v152_v7 = vpop.f32.mrf.mxu0 }
  0xc5   :  { %v1434_v8 = vadd.f32 %v152_v7, %v72_v6 }
  0xc6   :  { %v154_v9 = vpop.f32.mrf.mxu0 }
  0xc7   :  { %301 = vrot.lane.b32.xlu1 %v1434_v8, %s1333_s0  ;;  %323 = vrot.lane.b32.xlu0 %v1434_v8, %s1334_s21  ;;  %v1440_v10 = vadd.f32 %v154_v9, %v72_v6 }
  0xcb   :  { %279 = vrot.lane.b32.xlu1 %v1434_v8, %s1335_s22  ;;  %303 = vrot.lane.b32.xlu0 %v1440_v10, %s1333_s0 }
  0xcf   :  { %257 = vrot.lane.b32.xlu1 %v1434_v8, %s1336_s23  ;;  %281 = vrot.lane.b32.xlu0 %v1440_v10, %s1335_s22 }
  0xd3   :  { %325 = vrot.lane.b32.xlu1 %v1440_v10, %s1334_s21  ;;  %259 = vrot.lane.b32.xlu0 %v1440_v10, %s1336_s23 }
  0xd7   :  { %233 = vrot.lane.b32.xlu1 %v1434_v8, %s1337_s24  ;;  %235 = vrot.lane.b32.xlu0 %v1440_v10, %s1337_s24 }
  0xdb   :  { %211 = vrot.lane.b32.xlu1 %v1434_v8, %s1338_s25  ;;  %213 = vrot.lane.b32.xlu0 %v1440_v10, %s1338_s25 }
  0xdf   :  { %189 = vrot.lane.b32.xlu1 %v1434_v8, %s1339_s26  ;;  %191 = vrot.lane.b32.xlu0 %v1440_v10, %s1339_s26 }
  0xe3   :  { %165 = vrot.lane.b32.xlu1 %v1434_v8, %s1340_s27  ;;  %167 = vrot.lane.b32.xlu0 %v1440_v10, %s1340_s27 }
  0xe7   :  { %365 = vperm.xlu1 %1318, %v164_v11   ;;  %v1581_v11 = vrot.slane %v1284_v62, %v1480_v21 }
 0x139   :  { %v302_v12 = vpop.permute.xlu1 %301  ;;  %v324_v13 = vpop.permute.xlu0 %323 }
 0x13d   :  { %v280_v15 = vpop.permute.xlu1 %279  ;;  %v304_v17 = vpop.permute.xlu0 %303 }
 0x13e   :  { %v307_v32 = vsel %vm305_vm1, %v304_v17, %v302_v12  ;;  %v306_v37 = vsel %vm305_vm1, %v302_v12, %v304_v17 }
 0x13f   :  { %v320_v42 = vmul.f32 %v1500_v29, %v307_v32  ;;  %v319_v47 = vmul.f32 %v1497_v28, %v306_v37 }
 0x141   :  { %v258_v22 = vpop.permute.xlu1 %257  ;;  %v282_v23 = vpop.permute.xlu0 %281 }
 0x142   :  { %v285_v41 = vsel %vm283_vm3, %v282_v23, %v280_v15  ;;  %v284_v43 = vsel %vm283_vm3, %v280_v15, %v282_v23 }
 0x143   :  { %v298_v51 = vmul.f32 %v1506_v33, %v285_v41  ;;  %v297_v53 = vmul.f32 %v1521_v40, %v284_v43 }
 0x145   :  { %v326_v30 = vpop.permute.xlu1 %325  ;;  %v260_v31 = vpop.permute.xlu0 %259 }
 0x146   :  { %v328_v34 = vsel %vm327_vm2, %v324_v13, %v326_v30  ;;  %v329_v36 = vsel %vm327_vm2, %v326_v30, %v324_v13  ;;  %v263_v49 = vsel %vm261_vm4, %v260_v31, %v258_v22  ;;  %v262_v52 = vsel %vm261_vm4, %v258_v22, %v260_v31 }
 0x147   :  { %v342_v38 = vmul.f32 %v1491_v26, %v329_v36  ;;  %v341_v39 = vmul.f32 %v1494_v27, %v328_v34  ;;  %v276_v55 = vmul.f32 %v1529_v44, %v263_v49  ;;  %v275_v59 = vmul.f32 %v1533_v48, %v262_v52  ;;  %v673_v49 = vld [vmem:[%s1949_s10] sm:$0xff] }
 0x148   :  { %v1598_v22 = vrot.slane %v50_v5, %v1480_v21 }
 0x149   :  { %v234_v45 = vpop.permute.xlu1 %233  ;;  %386 = vmatprep.subr.mxu1 %v342_v38  ;;  %v236_v46 = vpop.permute.xlu0 %235 }
 0x14a   :  { %387 = vmatpush1.msra.mxu1 %v341_v39  ;;  %v238_v61 = vsel %vm237_vm5, %v234_v45, %v236_v46  ;;  %v239_v63 = vsel %vm237_vm5, %v236_v46, %v234_v45 }
 0x14b   :  { %388 = vmatprep.subr.mxu1 %v320_v42  ;;  %v252_v6 = vmul.f32 %v1550_v56, %v238_v61  ;;  %v251_v13 = vmul.f32 %v1555_v60, %v239_v63  ;;  %v460_v63 = vld [vmem:[%s1952_s7] sm:$0xff] }
 0x14c   :  { %389 = vmatpush1.msra.mxu1 %v319_v47  ;;  %v66_v47 = vld [vmem:[%s1944_s2 + $0x8] sm:$0xff] }
 0x14d   :  { %v212_v57 = vpop.permute.xlu1 %211  ;;  %390 = vmatprep.subr.mxu1 %v298_v51  ;;  %v214_v58 = vpop.permute.xlu0 %213  ;;  %1292 = vmatmul.mubr.msk.f32.gmra.mxu0 %vm79_vm0, %v66_v47 }
 0x14e   :  { %391 = vmatpush1.msra.mxu1 %v297_v53  ;;  %v216_v3 = vsel %vm215_vm6, %v212_v57, %v214_v58  ;;  %v217_v7 = vsel %vm215_vm6, %v214_v58, %v212_v57  ;;  %662 = vmatprep.mubr.f32.mxu0 %v1331_v2  ;;  %v456_v58 = vld [vmem:[%s1950_s6] sm:$0xff] }
 0x14f   :  { %392 = vmatprep.subr.mxu1 %v276_v55  ;;  %v230_v16 = vmul.f32 %v1565_v0, %v216_v3  ;;  %v229_v23 = vmul.f32 %v1569_v1, %v217_v7 }
 0x150   :  { %393 = vmatpush1.msra.mxu1 %v275_v59  ;;  %v48_v59 = vld [vmem:[%s1951_s12] sm:$0xff] }
 0x151   :  { %v190_v9 = vpop.permute.xlu1 %189  ;;  %394 = vmatprep.subr.mxu1 %v1440_v10  ;;  %v192_v12 = vpop.permute.xlu0 %191  ;;  %vm49_vm10 = vcmp.gt.f32.partialorder %v48_v59, 0.5 }
 0x152   :  { %v194_v15 = vsel %vm193_vm7, %v190_v9, %v192_v12  ;;  %395 = vmatpush1.msra.mxu1 %v1434_v8  ;;  %v195_v17 = vsel %vm193_vm7, %v192_v12, %v190_v9  ;;  %v477_v5 = vsel %vm49_vm10, 1, %v1332_v4 }
 0x153   :  { %396 = vmatprep.subr.mxu1 %v252_v6  ;;  %v208_v24 = vmul.f32 %v1581_v11, %v194_v15  ;;  %v207_v31 = vmul.f32 %v1585_v14, %v195_v17 }
 0x154   :  { %397 = vmatpush1.msra.mxu1 %v251_v13 }
 0x155   :  { %v166_v25 = vpop.permute.xlu1 %165  ;;  %398 = vmatprep.subr.mxu1 %v230_v16  ;;  %v168_v30 = vpop.permute.xlu0 %167 }
 0x156   :  { %v172_v32 = vsel %vm171_vm8, %v166_v25, %v168_v30  ;;  %v173_v20 = vsel %vm171_vm8, %v168_v30, %v166_v25  ;;  %399 = vmatpush1.msra.mxu1 %v229_v23 }
 0x157   :  { %v185_v21 = vmul.f32 %v1595_v19, %v173_v20  ;;  %v186_v34 = vmul.f32 %v1598_v22, %v172_v32  ;;  %400 = vmatprep.subr.mxu1 %v208_v24  ;;  %v674_v32 = vld [vmem:[%s1953_s11] sm:$0xff] }
 0x158   :  { %401 = vmatpush1.msra.mxu1 %v207_v31  ;;  %v489_v20 = vld [vmem:[%s1954_s9] sm:$0xff] }
 0x159   :  { %402 = vmatprep.subr.mxu1 %v186_v34 }
 0x15a   :  { %403 = vmatpush1.msra.mxu1 %v185_v21  ;;  %v68_v21 = vld [vmem:[%s1945_s3 + $0x8] sm:$0xff] }
 0x15b   :  { %1293 = vmatmul.mubr.msk.f32.vlgmr.msra.gmra.mxu1 %vm368_vm9, %v163_v35  ;;  %713 = vmatprep.subr.mxu1 %v1440_v10 }
 0x15c   :  { %714 = vmatpush1.msra.mxu1 %v1434_v8  ;;  %747 = vmatprep.mubr.f32.mxu1 %v1331_v2 }
 0x15f   :  { %1295 = vmatmul.mubr.msk.f32.vlgmr.msra.gmra.mxu1 %vm79_vm0, %v673_v49 }
 0x160   :  { %1158 = vmatprep.mubr.f32.mxu1 %v1331_v2 }
 0x162   :  { %v366_v36 = vpop.permute.xlu1 %365 }
 0x21b   :  { %v438_v37 = vpop.f32.mrf.mxu1 }
 0x21c   :  { %v439_v38 = vadd.f32 %v438_v37, %v366_v36 }
 0x21d   :  { %v440_v39 = vpop.f32.mrf.mxu1 }
 0x21e   :  { %v441_v41 = vadd.f32 %v440_v39, %v366_v36  ;;  %v448_v43 = vmul.f32 %v439_v38, %v439_v38 }
 0x220   :  { %v443_v42 = vadd.f32 %v441_v41, %v439_v38  ;;  %v449_v45 = vmul.f32 %v441_v41, %v441_v41 }
 0x222   :  { %444 = vadd.xlane.f32.xlu0 %v443_v42  ;;  %v450_v46 = vadd.f32 %v449_v45, %v448_v43 }
 0x224   :  { %451 = vadd.xlane.f32.xlu1 %v450_v46 }
 0x2ab   :  { %v445_v50 = vpop.xlane.xlu0 %444 }
 0x2ac   :  { %v447_v51 = vmul.f32 0.00390625, %v445_v50 }
 0x2ad   :  { %v452_v52 = vpop.xlane.xlu1 %451 }
 0x2ae   :  { %v454_v53 = vmul.f32 %v447_v51, %v447_v51  ;;  %v453_v54 = vmul.f32 0.00390625, %v452_v52 }
 0x2b0   :  { %v455_v55 = vsub.f32 %v453_v54, %v454_v53 }
 0x2b2   :  { %v457_v57 = vadd.f32 1e-05, %v455_v55 }
 0x2b4   :  { %1319 = vrsqrt.f32 %v457_v57 }
 0x2c1   :  { %v1320_v61 = vpop.eup %1319 }
 0x2c2   :  { %v459_v62 = vmul.f32 %v1320_v61, %v456_v58 }
 0x2c4   :  { %465 = vperm.xlu0 %1317, %v459_v62   ;;  %v461_v3 = vmul.f32 %v459_v62, %v447_v51 }
 0x2c6   :  { %v462_v6 = vsub.f32 %v460_v63, %v461_v3 }
 0x2c8   :  { %479 = vperm.xlu0 %1317, %v477_v5   ;;  %472 = vperm.xlu1 %1318, %v462_v6  }
 0x33f   :  { %v466_v7 = vpop.permute.xlu0 %465 }
 0x340   :  { %v468_v9 = vmul.f32 %v466_v7, %v439_v38  ;;  %v469_v12 = vmul.f32 %v466_v7, %v441_v41 }
 0x343   :  { %v1636_v13 = vpop.permute.xlu0 %479  ;;  %v473_v15 = vpop.permute.xlu1 %472 }
 0x344   :  { %vm481_vm11 = vcmp.eq.s32.totalorder %v1636_v13, 1  ;;  %v475_v16 = vadd.f32 %v473_v15, %v468_v9  ;;  %v476_v17 = vadd.f32 %v473_v15, %v469_v12  ;;  %v1305_v13 = vld [vmem:[%s1953_s11 + $0x8] sm:$0xff] }
 0x346   :  { %v482_v23 = vsel %vm481_vm11, %v475_v16, %v439_v38  ;;  %v483_v24 = vsel %vm481_vm11, %v476_v17, %v441_v41 }
 0x347   :  { %v484_v4 = vmul.f32 0.1, %v482_v23  ;;  %v485_v25 = vmul.f32 0.1, %v483_v24 }
 0x349   :  { %v1643_v30 = vmax.f32 %v482_v23, %v484_v4  ;;  %v1645_v31 = vmax.f32 %v483_v24, %v485_v25 }
 0x34b   :  { %564 = vrot.lane.b32.xlu0 %v1645_v31, %s1334_s21  ;;  %562 = vrot.lane.b32.xlu1 %v1643_v30, %s1334_s21 }
 0x34f   :  { %554 = vrot.lane.b32.xlu0 %v1645_v31, %s1333_s0  ;;  %552 = vrot.lane.b32.xlu1 %v1643_v30, %s1333_s0 }
 0x353   :  { %544 = vrot.lane.b32.xlu0 %v1645_v31, %s1335_s22  ;;  %542 = vrot.lane.b32.xlu1 %v1643_v30, %s1335_s22 }
 0x357   :  { %534 = vrot.lane.b32.xlu0 %v1645_v31, %s1336_s23  ;;  %532 = vrot.lane.b32.xlu1 %v1643_v30, %s1336_s23 }
 0x35b   :  { %522 = vrot.lane.b32.xlu0 %v1645_v31, %s1337_s24  ;;  %520 = vrot.lane.b32.xlu1 %v1643_v30, %s1337_s24 }
 0x35f   :  { %512 = vrot.lane.b32.xlu0 %v1645_v31, %s1338_s25  ;;  %510 = vrot.lane.b32.xlu1 %v1643_v30, %s1338_s25 }
 0x363   :  { %502 = vrot.lane.b32.xlu0 %v1645_v31, %s1339_s26  ;;  %500 = vrot.lane.b32.xlu1 %v1643_v30, %s1339_s26 }
 0x367   :  { %492 = vrot.lane.b32.xlu0 %v1645_v31, %s1340_s27  ;;  %490 = vrot.lane.b32.xlu1 %v1643_v30, %s1340_s27 }
 0x36b   :  { %677 = vperm.xlu0 %1317, %v674_v32   ;;  %592 = vperm.xlu1 %1318, %v489_v20  }
 0x36f   :  { %76 = vperm.xlu1 %1318, %v68_v21  }
 0x3bd   :  { %v565_v34 = vpop.permute.xlu0 %564  ;;  %v563_v35 = vpop.permute.xlu1 %562 }
 0x3be   :  { %v566_v36 = vsel %vm327_vm2, %v563_v35, %v565_v34  ;;  %v567_v37 = vsel %vm327_vm2, %v565_v34, %v563_v35 }
 0x3bf   :  { %v568_v38 = vmul.f32 %v566_v36, %v1494_v27  ;;  %v569_v39 = vmul.f32 %v567_v37, %v1491_v26 }
 0x3c1   :  { %v555_v41 = vpop.permute.xlu0 %554  ;;  %612 = vmatprep.subr.mxu0 %v569_v39  ;;  %v553_v42 = vpop.permute.xlu1 %552  ;;  %v488_v39 = vld [vmem:[%s1955_s8] sm:$0xff] }
 0x3c2   :  { %v556_v43 = vsel %vm305_vm1, %v553_v42, %v555_v41  ;;  %v557_v45 = vsel %vm305_vm1, %v555_v41, %v553_v42  ;;  %613 = vmatpush1.msra.mxu0 %v568_v38  ;;  %v158_v41 = vpop.f32.mrf.mxu0 }
 0x3c3   :  { %v558_v46 = vmul.f32 %v556_v43, %v1497_v28  ;;  %v559_v47 = vmul.f32 %v557_v45, %v1500_v29  ;;  %v749_v45 = vpop.f32.mrf.mxu1 }
 0x3c4   :  { %v160_v43 = vpop.f32.mrf.mxu0 }
 0x3c5   :  { %v545_v49 = vpop.permute.xlu0 %544  ;;  %614 = vmatprep.subr.mxu0 %v559_v47  ;;  %v543_v50 = vpop.permute.xlu1 %542 }
 0x3c6   :  { %v546_v51 = vsel %vm283_vm3, %v543_v50, %v545_v49  ;;  %v547_v52 = vsel %vm283_vm3, %v545_v49, %v543_v50  ;;  %615 = vmatpush1.msra.mxu0 %v558_v46 }
 0x3c7   :  { %v548_v53 = vmul.f32 %v546_v51, %v1521_v40  ;;  %v549_v54 = vmul.f32 %v547_v52, %v1506_v33 }
 0x3c9   :  { %v535_v55 = vpop.permute.xlu0 %534  ;;  %616 = vmatprep.subr.mxu0 %v549_v54  ;;  %v533_v57 = vpop.permute.xlu1 %532 }
 0x3ca   :  { %v536_v58 = vsel %vm261_vm4, %v533_v57, %v535_v55  ;;  %v537_v59 = vsel %vm261_vm4, %v535_v55, %v533_v57  ;;  %617 = vmatpush1.msra.mxu0 %v548_v53  ;;  %v751_v53 = vpop.f32.mrf.mxu1 }
 0x3cb   :  { %v538_v61 = vmul.f32 %v536_v58, %v1533_v48  ;;  %v539_v62 = vmul.f32 %v537_v59, %v1529_v44 }
 0x3cd   :  { %v523_v63 = vpop.permute.xlu0 %522  ;;  %618 = vmatprep.subr.mxu0 %v539_v62  ;;  %v521_v3 = vpop.permute.xlu1 %520 }
 0x3ce   :  { %v524_v5 = vsel %vm237_vm5, %v521_v3, %v523_v63  ;;  %v525_v6 = vsel %vm237_vm5, %v523_v63, %v521_v3  ;;  %619 = vmatpush1.msra.mxu0 %v538_v61 }
 0x3cf   :  { %v526_v7 = vmul.f32 %v525_v6, %v1555_v60  ;;  %v527_v9 = vmul.f32 %v524_v5, %v1550_v56  ;;  %620 = vmatprep.subr.mxu0 %v1645_v31 }
 0x3d0   :  { %621 = vmatpush1.msra.mxu0 %v1643_v30 }
 0x3d1   :  { %v513_v12 = vpop.permute.xlu0 %512  ;;  %622 = vmatprep.subr.mxu0 %v527_v9  ;;  %v511_v15 = vpop.permute.xlu1 %510 }
 0x3d2   :  { %v514_v16 = vsel %vm215_vm6, %v511_v15, %v513_v12  ;;  %v515_v17 = vsel %vm215_vm6, %v513_v12, %v511_v15  ;;  %623 = vmatpush1.msra.mxu0 %v526_v7 }
 0x3d3   :  { %v516_v23 = vmul.f32 %v515_v17, %v1569_v1  ;;  %v517_v24 = vmul.f32 %v514_v16, %v1565_v0 }
 0x3d5   :  { %v503_v4 = vpop.permute.xlu0 %502  ;;  %624 = vmatprep.subr.mxu0 %v517_v24  ;;  %v501_v25 = vpop.permute.xlu1 %500 }
 0x3d6   :  { %v504_v30 = vsel %vm193_vm7, %v501_v25, %v503_v4  ;;  %v505_v31 = vsel %vm193_vm7, %v503_v4, %v501_v25  ;;  %625 = vmatpush1.msra.mxu0 %v516_v23  ;;  %v1297_v25 = vld [vmem:[%s1946_s5 + $0x8] sm:$0xff] }
 0x3d7   :  { %v506_v32 = vmul.f32 %v505_v31, %v1585_v14  ;;  %v507_v20 = vmul.f32 %v504_v30, %v1581_v11 }
 0x3d9   :  { %v493_v21 = vpop.permute.xlu0 %492  ;;  %626 = vmatprep.subr.mxu0 %v507_v20  ;;  %v491_v34 = vpop.permute.xlu1 %490 }
 0x3da   :  { %v494_v35 = vsel %vm171_vm8, %v491_v34, %v493_v21  ;;  %v495_v36 = vsel %vm171_vm8, %v493_v21, %v491_v34  ;;  %627 = vmatpush1.msra.mxu0 %v506_v32 }
 0x3db   :  { %v496_v37 = vmul.f32 %v495_v36, %v1595_v19  ;;  %v497_v38 = vmul.f32 %v494_v35, %v1598_v22 }
 0x3dd   :  { %628 = vmatprep.subr.mxu0 %v497_v38 }
 0x3de   :  { %629 = vmatpush1.msra.mxu0 %v496_v37 }
 0x3df   :  { %1294 = vmatmul.mubr.msk.f32.vlgmr.msra.gmra.mxu0 %vm368_vm9, %v488_v39 }
 0x3e0   :  { %934 = vmatprep.mubr.f32.mxu0 %v1331_v2 }
 0x3e6   :  { %v593_v42 = vpop.permute.xlu1 %592  ;;  %v678_v49 = vpop.permute.xlu0 %677 }
 0x3e7   :  { %v750_v55 = vadd.f32 %v749_v45, %v678_v49  ;;  %v752_v59 = vadd.f32 %v751_v53, %v678_v49 }
 0x3ea   :  { %v77_v54 = vpop.permute.xlu1 %76 }
 0x3eb   :  { %v159_v61 = vadd.f32 %v158_v41, %v77_v54  ;;  %v161_v3 = vadd.f32 %v160_v43, %v77_v54 }
 0x49f   :  { %v664_v46 = vpop.f32.mrf.mxu0 }
 0x4a0   :  { %v665_v47 = vadd.f32 %v664_v46, %v593_v42 }
 0x4a1   :  { %v666_v50 = vpop.f32.mrf.mxu0 }
 0x4a2   :  { %v669_v51 = vmul.f32 0.1, %v665_v47  ;;  %v667_v52 = vadd.f32 %v666_v50, %v593_v42 }
 0x4a4   :  { %v671_v57 = vmax.f32 %v665_v47, %v669_v51  ;;  %v670_v58 = vmul.f32 0.1, %v667_v52 }
 0x4a6   :  { %v754_v62 = vadd.f32 %v750_v55, %v671_v57  ;;  %v672_v63 = vmax.f32 %v667_v52, %v670_v58 }
 0x4a8   :  { %v1743_v5 = vsub.f32 %v159_v61, %v754_v62  ;;  %v755_v6 = vadd.f32 %v752_v59, %v672_v63 }
 0x4aa   :  { %v1266_v7 = vmul.f32 0.5, %v1743_v5  ;;  %v1746_v9 = vsub.f32 %v161_v3, %v755_v6  ;;  %834 = vrot.lane.b32.xlu0 %v1743_v5, %s1334_s21 }
 0x4ac   :  { %1321 = vtanh.f32 %v1266_v7  ;;  %v1267_v12 = vmul.f32 0.5, %v1746_v9  ;;  %836 = vrot.lane.b32.xlu1 %v1746_v9, %s1334_s21 }
 0x4ae   :  { %1323 = vtanh.f32 %v1267_v12  ;;  %824 = vrot.lane.b32.xlu0 %v1743_v5, %s1333_s0 }
 0x4b0   :  { %826 = vrot.lane.b32.xlu1 %v1746_v9, %s1333_s0 }
 0x4b2   :  { %814 = vrot.lane.b32.xlu0 %v1743_v5, %s1335_s22 }
 0x4b4   :  { %816 = vrot.lane.b32.xlu1 %v1746_v9, %s1335_s22 }
 0x4b6   :  { %804 = vrot.lane.b32.xlu0 %v1743_v5, %s1336_s23 }
 0x4b8   :  { %806 = vrot.lane.b32.xlu1 %v1746_v9, %s1336_s23 }
 0x4b9   :  { %v1322_v15 = vpop.eup %1321 }
 0x4ba   :  { %v1270_v16 = vmul.f32 0.5, %v1322_v15  ;;  %792 = vrot.lane.b32.xlu0 %v1743_v5, %s1337_s24 }
 0x4bb   :  { %v1324_v17 = vpop.eup %1323 }
 0x4bc   :  { %v1272_v23 = vadd.f32 0.5, %v1270_v16  ;;  %v1271_v24 = vmul.f32 0.5, %v1324_v17  ;;  %794 = vrot.lane.b32.xlu1 %v1746_v9, %s1337_s24 }
 0x4be   :  { %1274 = vst [vmem:[%s1956_s14] sm:$0xff] %v1272_v23  ;;  %v1273_v4 = vadd.f32 0.5, %v1271_v24  ;;  %782 = vrot.lane.b32.xlu0 %v1743_v5, %s1338_s25 }
 0x4c0   :  { %1275 = vst [vmem:[%s1956_s14 + $0x8] sm:$0xff] %v1273_v4  ;;  %784 = vrot.lane.b32.xlu1 %v1746_v9, %s1338_s25 }
 0x4c2   :  { %772 = vrot.lane.b32.xlu0 %v1743_v5, %s1339_s26 }
 0x4c4   :  { %774 = vrot.lane.b32.xlu1 %v1746_v9, %s1339_s26 }
 0x4c6   :  { %762 = vrot.lane.b32.xlu0 %v1743_v5, %s1340_s27 }
 0x4c8   :  { %764 = vrot.lane.b32.xlu1 %v1746_v9, %s1340_s27 }
 0x4ca   :  { %864 = vperm.xlu0 %1317, %v1297_v25  }
 0x51c   :  { %v835_v30 = vpop.permute.xlu0 %834 }
 0x51e   :  { %v837_v31 = vpop.permute.xlu1 %836 }
 0x51f   :  { %v838_v32 = vsel %vm327_vm2, %v835_v30, %v837_v31  ;;  %v839_v20 = vsel %vm327_vm2, %v837_v31, %v835_v30 }
 0x520   :  { %v840_v21 = vmul.f32 %v838_v32, %v1494_v27  ;;  %v841_v34 = vmul.f32 %v839_v20, %v1491_v26  ;;  %v825_v35 = vpop.permute.xlu0 %824 }
 0x522   :  { %v827_v36 = vpop.permute.xlu1 %826  ;;  %884 = vmatprep.subr.mxu0 %v841_v34 }
 0x523   :  { %v828_v37 = vsel %vm305_vm1, %v825_v35, %v827_v36  ;;  %v829_v38 = vsel %vm305_vm1, %v827_v36, %v825_v35  ;;  %885 = vmatpush1.msra.mxu0 %v840_v21  ;;  %v1296_v36 = vld [vmem:[%s1948_s4 + $0x8] sm:$0xff] }
 0x524   :  { %v830_v39 = vmul.f32 %v828_v37, %v1497_v28  ;;  %v831_v41 = vmul.f32 %v829_v38, %v1500_v29  ;;  %v815_v42 = vpop.permute.xlu0 %814 }
 0x526   :  { %v817_v43 = vpop.permute.xlu1 %816  ;;  %886 = vmatprep.subr.mxu0 %v831_v41 }
 0x527   :  { %v818_v45 = vsel %vm283_vm3, %v815_v42, %v817_v43  ;;  %v819_v46 = vsel %vm283_vm3, %v817_v43, %v815_v42  ;;  %887 = vmatpush1.msra.mxu0 %v830_v39 }
 0x528   :  { %v820_v47 = vmul.f32 %v818_v45, %v1521_v40  ;;  %v821_v49 = vmul.f32 %v819_v46, %v1506_v33  ;;  %v805_v50 = vpop.permute.xlu0 %804 }
 0x52a   :  { %v807_v51 = vpop.permute.xlu1 %806  ;;  %888 = vmatprep.subr.mxu0 %v821_v49  ;;  %v1304_v49 = vld [vmem:[%s1949_s10 + $0x8] sm:$0xff] }
 0x52b   :  { %v808_v52 = vsel %vm261_vm4, %v805_v50, %v807_v51  ;;  %v809_v53 = vsel %vm261_vm4, %v807_v51, %v805_v50  ;;  %889 = vmatpush1.msra.mxu0 %v820_v47 }
 0x52c   :  { %v810_v54 = vmul.f32 %v808_v52, %v1533_v48  ;;  %v811_v55 = vmul.f32 %v809_v53, %v1529_v44  ;;  %v793_v57 = vpop.permute.xlu0 %792 }
 0x52e   :  { %v795_v58 = vpop.permute.xlu1 %794  ;;  %890 = vmatprep.subr.mxu0 %v811_v55 }
 0x52f   :  { %v796_v59 = vsel %vm237_vm5, %v793_v57, %v795_v58  ;;  %v797_v61 = vsel %vm237_vm5, %v795_v58, %v793_v57  ;;  %891 = vmatpush1.msra.mxu0 %v810_v54  ;;  %v1299_v54 = vld [vmem:[%s1950_s6 + $0x8] sm:$0xff] }
 0x530   :  { %v798_v62 = vmul.f32 %v797_v61, %v1555_v60  ;;  %v799_v63 = vmul.f32 %v796_v59, %v1550_v56  ;;  %892 = vmatprep.subr.mxu0 %v1746_v9  ;;  %v783_v3 = vpop.permute.xlu0 %782  ;;  %v1300_v58 = vld [vmem:[%s1952_s7 + $0x8] sm:$0xff] }
 0x531   :  { %893 = vmatpush1.msra.mxu0 %v1743_v5 }
 0x532   :  { %v785_v6 = vpop.permute.xlu1 %784  ;;  %894 = vmatprep.subr.mxu0 %v799_v63 }
 0x533   :  { %v786_v7 = vsel %vm215_vm6, %v783_v3, %v785_v6  ;;  %v787_v12 = vsel %vm215_vm6, %v785_v6, %v783_v3  ;;  %895 = vmatpush1.msra.mxu0 %v798_v62 }
 0x534   :  { %v788_v15 = vmul.f32 %v787_v12, %v1569_v1  ;;  %v789_v16 = vmul.f32 %v786_v7, %v1565_v0  ;;  %v773_v17 = vpop.permute.xlu0 %772 }
 0x536   :  { %v775_v23 = vpop.permute.xlu1 %774  ;;  %896 = vmatprep.subr.mxu0 %v789_v16 }
 0x537   :  { %v776_v24 = vsel %vm193_vm7, %v773_v17, %v775_v23  ;;  %v777_v4 = vsel %vm193_vm7, %v775_v23, %v773_v17  ;;  %897 = vmatpush1.msra.mxu0 %v788_v15 }
 0x538   :  { %v778_v25 = vmul.f32 %v777_v4, %v1585_v14  ;;  %v779_v30 = vmul.f32 %v776_v24, %v1581_v11  ;;  %v763_v31 = vpop.permute.xlu0 %762 }
 0x53a   :  { %v765_v32 = vpop.permute.xlu1 %764  ;;  %898 = vmatprep.subr.mxu0 %v779_v30 }
 0x53b   :  { %v766_v20 = vsel %vm171_vm8, %v763_v31, %v765_v32  ;;  %v767_v21 = vsel %vm171_vm8, %v765_v32, %v763_v31  ;;  %899 = vmatpush1.msra.mxu0 %v778_v25  ;;  %v1302_v25 = vld [vmem:[%s1954_s9 + $0x8] sm:$0xff] }
 0x53c   :  { %v768_v34 = vmul.f32 %v767_v21, %v1595_v19  ;;  %v769_v35 = vmul.f32 %v766_v20, %v1598_v22 }
 0x53e   :  { %900 = vmatprep.subr.mxu0 %v769_v35 }
 0x53f   :  { %901 = vmatpush1.msra.mxu0 %v768_v34 }
 0x540   :  { %1298 = vmatmul.mubr.msk.f32.vlgmr.msra.gmra.mxu0 %vm368_vm9, %v1296_v36  ;;  %1211 = vmatprep.subr.mxu0 %v1746_v9 }
 0x541   :  { %1212 = vmatpush1.msra.mxu0 %v1743_v5  ;;  %1245 = vmatprep.mubr.f32.mxu0 %v1331_v2 }
 0x544   :  { %1306 = vmatmul.mubr.msk.f32.vlgmr.msra.gmra.mxu0 %vm79_vm0, %v1304_v49 }
 0x545   :  { %v865_v37 = vpop.permute.xlu0 %864 }
 0x600   :  { %v936_v38 = vpop.f32.mrf.mxu0 }
 0x601   :  { %v937_v39 = vadd.f32 %v936_v38, %v865_v37 }
 0x602   :  { %v938_v41 = vpop.f32.mrf.mxu0 }
 0x603   :  { %v939_v42 = vadd.f32 %v938_v41, %v865_v37  ;;  %v945_v45 = vmul.f32 %v937_v39, %v937_v39 }
 0x605   :  { %v941_v43 = vadd.f32 %v939_v42, %v937_v39  ;;  %v946_v46 = vmul.f32 %v939_v42, %v939_v42 }
 0x607   :  { %942 = vadd.xlane.f32.xlu1 %v941_v43  ;;  %v947_v47 = vadd.f32 %v946_v46, %v945_v45 }
 0x609   :  { %948 = vadd.xlane.f32.xlu0 %v947_v47 }
 0x690   :  { %v943_v5 = vpop.xlane.xlu1 %942 }
 0x691   :  { %v944_v9 = vmul.f32 0.00390625, %v943_v5 }
 0x692   :  { %v949_v2 = vpop.xlane.xlu0 %948 }
 0x693   :  { %v951_v50 = vmul.f32 %v944_v9, %v944_v9  ;;  %v950_v51 = vmul.f32 0.00390625, %v949_v2 }
 0x695   :  { %v952_v52 = vsub.f32 %v950_v51, %v951_v50 }
 0x697   :  { %v955_v53 = vadd.f32 1e-05, %v952_v52 }
 0x699   :  { %1325 = vrsqrt.f32 %v955_v53 }
 0x6a6   :  { %v1326_v55 = vpop.eup %1325 }
 0x6a7   :  { %v957_v57 = vmul.f32 %v1326_v55, %v1299_v54 }
 0x6a9   :  { %964 = vperm.xlu0 %1317, %v957_v57   ;;  %v960_v59 = vmul.f32 %v957_v57, %v944_v9 }
 0x6ab   :  { %v961_v61 = vsub.f32 %v1300_v58, %v960_v59 }
 0x6ad   :  { %971 = vperm.xlu1 %1318, %v961_v61  }
 0x724   :  { %v965_v62 = vpop.permute.xlu0 %964 }
 0x725   :  { %v967_v63 = vmul.f32 %v965_v62, %v937_v39  ;;  %v968_v3 = vmul.f32 %v965_v62, %v939_v42 }
 0x728   :  { %v972_v6 = vpop.permute.xlu1 %971 }
 0x729   :  { %v974_v7 = vadd.f32 %v972_v6, %v967_v63  ;;  %v975_v12 = vadd.f32 %v972_v6, %v968_v3 }
 0x72b   :  { %v976_v15 = vsel %vm481_vm11, %v974_v7, %v937_v39  ;;  %v977_v16 = vsel %vm481_vm11, %v975_v12, %v939_v42 }
 0x72c   :  { %v978_v17 = vmul.f32 0.1, %v976_v15  ;;  %v979_v23 = vmul.f32 0.1, %v977_v16 }
 0x72e   :  { %v980_v24 = vmax.f32 %v976_v15, %v978_v17  ;;  %v981_v4 = vmax.f32 %v977_v16, %v979_v23 }
 0x730   :  { %1060 = vrot.lane.b32.xlu0 %v981_v4, %s1334_s21  ;;  %1058 = vrot.lane.b32.xlu1 %v980_v24, %s1334_s21 }
 0x734   :  { %1050 = vrot.lane.b32.xlu0 %v981_v4, %s1333_s0  ;;  %1048 = vrot.lane.b32.xlu1 %v980_v24, %s1333_s0 }
 0x738   :  { %1040 = vrot.lane.b32.xlu0 %v981_v4, %s1335_s22  ;;  %1038 = vrot.lane.b32.xlu1 %v980_v24, %s1335_s22 }
 0x73c   :  { %1030 = vrot.lane.b32.xlu0 %v981_v4, %s1336_s23  ;;  %1028 = vrot.lane.b32.xlu1 %v980_v24, %s1336_s23 }
 0x740   :  { %1018 = vrot.lane.b32.xlu0 %v981_v4, %s1337_s24  ;;  %1016 = vrot.lane.b32.xlu1 %v980_v24, %s1337_s24 }
 0x744   :  { %1008 = vrot.lane.b32.xlu0 %v981_v4, %s1338_s25  ;;  %1006 = vrot.lane.b32.xlu1 %v980_v24, %s1338_s25 }
 0x748   :  { %998 = vrot.lane.b32.xlu0 %v981_v4, %s1339_s26  ;;  %996 = vrot.lane.b32.xlu1 %v980_v24, %s1339_s26 }
 0x74c   :  { %988 = vrot.lane.b32.xlu0 %v981_v4, %s1340_s27  ;;  %986 = vrot.lane.b32.xlu1 %v980_v24, %s1340_s27 }
 0x750   :  { %1175 = vperm.xlu0 %1317, %v1305_v13   ;;  %1088 = vperm.xlu1 %1318, %v1302_v25  }
 0x7a2   :  { %v1061_v30 = vpop.permute.xlu0 %1060  ;;  %v1059_v31 = vpop.permute.xlu1 %1058 }
 0x7a3   :  { %v1062_v32 = vsel %vm327_vm2, %v1059_v31, %v1061_v30  ;;  %v1063_v20 = vsel %vm327_vm2, %v1061_v30, %v1059_v31 }
 0x7a4   :  { %v1064_v21 = vmul.f32 %v1062_v32, %v1494_v27  ;;  %v1065_v34 = vmul.f32 %v1063_v20, %v1491_v26 }
 0x7a6   :  { %v1051_v35 = vpop.permute.xlu0 %1050  ;;  %1108 = vmatprep.subr.mxu1 %v1065_v34  ;;  %v1049_v36 = vpop.permute.xlu1 %1048 }
 0x7a7   :  { %v1052_v37 = vsel %vm305_vm1, %v1049_v36, %v1051_v35  ;;  %v1053_v38 = vsel %vm305_vm1, %v1051_v35, %v1049_v36  ;;  %1109 = vmatpush1.msra.mxu1 %v1064_v21 }
 0x7a8   :  { %v1054_v39 = vmul.f32 %v1052_v37, %v1497_v28  ;;  %v1055_v41 = vmul.f32 %v1053_v38, %v1500_v29 }
 0x7aa   :  { %v1041_v42 = vpop.permute.xlu0 %1040  ;;  %1110 = vmatprep.subr.mxu1 %v1055_v41  ;;  %v1039_v43 = vpop.permute.xlu1 %1038 }
 0x7ab   :  { %v1042_v26 = vsel %vm283_vm3, %v1039_v43, %v1041_v42  ;;  %v1043_v27 = vsel %vm283_vm3, %v1041_v42, %v1039_v43  ;;  %1111 = vmatpush1.msra.mxu1 %v1054_v39 }
 0x7ac   :  { %v1044_v45 = vmul.f32 %v1042_v26, %v1521_v40  ;;  %v1045_v46 = vmul.f32 %v1043_v27, %v1506_v33 }
 0x7ae   :  { %v1031_v47 = vpop.permute.xlu0 %1030  ;;  %1112 = vmatprep.subr.mxu1 %v1045_v46  ;;  %v1029_v49 = vpop.permute.xlu1 %1028 }
 0x7af   :  { %v1032_v28 = vsel %vm261_vm4, %v1029_v49, %v1031_v47  ;;  %v1033_v29 = vsel %vm261_vm4, %v1031_v47, %v1029_v49  ;;  %1113 = vmatpush1.msra.mxu1 %v1044_v45 }
 0x7b0   :  { %v1034_v5 = vmul.f32 %v1032_v28, %v1533_v48  ;;  %v1035_v9 = vmul.f32 %v1033_v29, %v1529_v44 }
 0x7b2   :  { %v1019_v2 = vpop.permute.xlu0 %1018  ;;  %1114 = vmatprep.subr.mxu1 %v1035_v9  ;;  %v1017_v50 = vpop.permute.xlu1 %1016 }
 0x7b3   :  { %v1020_v33 = vsel %vm237_vm5, %v1017_v50, %v1019_v2  ;;  %v1021_v40 = vsel %vm237_vm5, %v1019_v2, %v1017_v50  ;;  %1115 = vmatpush1.msra.mxu1 %v1034_v5 }
 0x7b4   :  { %v1022_v51 = vmul.f32 %v1021_v40, %v1555_v60  ;;  %v1023_v52 = vmul.f32 %v1020_v33, %v1550_v56  ;;  %1116 = vmatprep.subr.mxu1 %v981_v4 }
 0x7b5   :  { %1117 = vmatpush1.msra.mxu1 %v980_v24 }
 0x7b6   :  { %v1009_v53 = vpop.permute.xlu0 %1008  ;;  %1118 = vmatprep.subr.mxu1 %v1023_v52  ;;  %v1007_v48 = vpop.permute.xlu1 %1006 }
 0x7b7   :  { %v1010_v44 = vsel %vm215_vm6, %v1007_v48, %v1009_v53  ;;  %v1011_v54 = vsel %vm215_vm6, %v1009_v53, %v1007_v48  ;;  %1119 = vmatpush1.msra.mxu1 %v1022_v51 }
 0x7b8   :  { %v1012_v55 = vmul.f32 %v1011_v54, %v1569_v1  ;;  %v1013_v57 = vmul.f32 %v1010_v44, %v1565_v0 }
 0x7ba   :  { %v999_v58 = vpop.permute.xlu0 %998  ;;  %1120 = vmatprep.subr.mxu1 %v1013_v57  ;;  %v997_v60 = vpop.permute.xlu1 %996 }
 0x7bb   :  { %v1000_v56 = vsel %vm193_vm7, %v997_v60, %v999_v58  ;;  %v1001_v59 = vsel %vm193_vm7, %v999_v58, %v997_v60  ;;  %1121 = vmatpush1.msra.mxu1 %v1012_v55 }
 0x7bc   :  { %v1002_v61 = vmul.f32 %v1001_v59, %v1585_v14  ;;  %v1003_v62 = vmul.f32 %v1000_v56, %v1581_v11  ;;  %v1301_v14 = vld [vmem:[%s1955_s8 + $0x8] sm:$0xff]  ;;  %v1247_v11 = vpop.f32.mrf.mxu0 }
 0x7be   :  { %v989_v63 = vpop.permute.xlu0 %988  ;;  %1122 = vmatprep.subr.mxu1 %v1003_v62  ;;  %v987_v3 = vpop.permute.xlu1 %986 }
 0x7bf   :  { %v990_v0 = vsel %vm171_vm8, %v987_v3, %v989_v63  ;;  %v991_v1 = vsel %vm171_vm8, %v989_v63, %v987_v3  ;;  %1123 = vmatpush1.msra.mxu1 %v1002_v61  ;;  %v1249_v4 = vpop.f32.mrf.mxu0 }
 0x7c0   :  { %v992_v6 = vmul.f32 %v991_v1, %v1595_v19  ;;  %v993_v7 = vmul.f32 %v990_v0, %v1598_v22 }
 0x7c2   :  { %1124 = vmatprep.subr.mxu1 %v993_v7 }
 0x7c3   :  { %1125 = vmatpush1.msra.mxu1 %v992_v6 }
 0x7c4   :  { %1303 = vmatmul.mubr.msk.f32.vlgmr.msra.gmra.mxu1 %vm368_vm9, %v1301_v14 }
 0x7cb   :  { %v1089_v12 = vpop.permute.xlu1 %1088  ;;  %v1176_v17 = vpop.permute.xlu0 %1175 }
 0x7cc   :  { %v1248_v19 = vadd.f32 %v1247_v11, %v1176_v17  ;;  %v1250_v25 = vadd.f32 %v1249_v4, %v1176_v17 }
 0x884   :  { %v1160_v15 = vpop.f32.mrf.mxu1 }
 0x885   :  { %v1161_v16 = vadd.f32 %v1160_v15, %v1089_v12 }
 0x886   :  { %v1162_v18 = vpop.f32.mrf.mxu1 }
 0x887   :  { %v1165_v23 = vmul.f32 0.1, %v1161_v16  ;;  %v1163_v24 = vadd.f32 %v1162_v18, %v1089_v12 }
 0x889   :  { %v1167_v13 = vmax.f32 %v1161_v16, %v1165_v23  ;;  %v1166_v22 = vmul.f32 0.1, %v1163_v24 }
 0x88b   :  { %v1252_v30 = vadd.f32 %v1248_v19, %v1167_v13  ;;  %v1168_v31 = vmax.f32 %v1163_v24, %v1166_v22 }
 0x88d   :  { %v1254_v32 = vadd.f32 %v1252_v30, %v1434_v8  ;;  %v1253_v20 = vadd.f32 %v1250_v25, %v1168_v31 }
 0x88f   :  { %v1256_v21 = vmul.f32 0.5, %v1254_v32  ;;  %v1255_v34 = vadd.f32 %v1253_v20, %v1440_v10 }
 0x891   :  { %1327 = vtanh.f32 %v1256_v21  ;;  %v1257_v35 = vmul.f32 0.5, %v1255_v34 }
 0x893   :  { %1329 = vtanh.f32 %v1257_v35 }
 0x89e   :  { %v1328_v36 = vpop.eup %1327 }
 0x89f   :  { %v1260_v37 = vmul.f32 0.5, %v1328_v36 }
 0x8a0   :  { %v1330_v38 = vpop.eup %1329 }
 0x8a1   :  { %v1262_v39 = vadd.f32 0.5, %v1260_v37  ;;  %v1261_v41 = vmul.f32 0.5, %v1330_v38 }
 0x8a3   :  { %1264 = vst [vmem:[%s1957_s13] sm:$0xff] %v1262_v39  ;;  %v1263_v42 = vadd.f32 0.5, %v1261_v41 }
 0x8a5   :  { %1265 = vst [vmem:[%s1957_s13 + $0x8] sm:$0xff] %v1263_v42 }

</bundles_post_ra>
